<compile_context>
chip_gen: v7x
topology: tpu7x:2x2x1
jax: 0.10.0
libtpu: 0.0.40
codegen_flags: <defaults>
</compile_context>

<pallas_src>
import functools
import math

import jax
import jax.numpy as jnp
from jax.experimental import pallas as pl
from jax.experimental.pallas import tpu as pltpu

_EPS = 1e-5
_TAU = 2.0 * math.pi
_LANE = 128


def _round_up(n, m):
    return ((n + m - 1) // m) * m


def _pad2(a, rows, cols):
    return jnp.pad(a, ((0, rows - a.shape[0]), (0, cols - a.shape[1])))


def _pad1(a, n):
    return jnp.pad(a, (0, n - a.shape[0]))


# ---------------------------------------------------------------------------
# In-kernel helpers
# ---------------------------------------------------------------------------
def _row_mask(tile_m, m_real):
    # 1.0 for real rows, 0.0 for M-padding rows (keeps BN stats exact).
    row = pl.program_id(0) * tile_m + jax.lax.broadcasted_iota(
        jnp.int32, (tile_m, 1), 0)
    return (row < m_real).astype(jnp.float32)


def _partial_sums(v, mask):
    # per-channel [sum, sum of squares] over this tile's rows -> (1, C) each
    vm = v if mask is None else v * mask
    return (jnp.sum(vm, axis=0, keepdims=True),
            jnp.sum(vm * v, axis=0, keepdims=True))


def _silu(v):
    return v * jax.nn.sigmoid(v)


# ---------------------------------------------------------------------------
# Kernels
# ---------------------------------------------------------------------------
def _stats1_kernel(x_ref, w1_ref, st_ref, *, m_real, tile_m):
    """h = tau * x @ W1 ; emit ONLY partial BN1 statistics of sin(h), cos(h)."""
    x = x_ref[...].astype(jnp.float32)
    h = _TAU * jnp.dot(x, w1_ref[...], preferred_element_type=jnp.float32)
    s = jnp.sin(h)
    c = jnp.cos(h)
    mask = None if m_real is None else _row_mask(tile_m, m_real)
    s_sum, s_sq = _partial_sums(s, mask)
    c_sum, c_sq = _partial_sums(c, mask)
    st_ref[...] = jnp.concatenate([s_sum, c_sum, s_sq, c_sq], axis=0)[None]


def _layer2_kernel(x_ref, cat_ref, w1_ref,
                   sc_s_ref, sh_s_ref, sc_c_ref, sh_c_ref,
                   w_s_ref, w_c_ref, w_k_ref, b_ref,
                   o_ref, st_ref, *, m_real, tile_m):
    """Recompute Fourier features, BN1+SiLU, split-weight linear2, BN2 stats."""
    x = x_ref[...].astype(jnp.float32)
    h = _TAU * jnp.dot(x, w1_ref[...], preferred_element_type=jnp.float32)
    a = _silu(jnp.sin(h) * sc_s_ref[...] + sh_s_ref[...])
    b = _silu(jnp.cos(h) * sc_c_ref[...] + sh_c_ref[...])
    k = cat_ref[...].astype(jnp.float32)
    h2 = (jnp.dot(a, w_s_ref[...], preferred_element_type=jnp.float32)
          + jnp.dot(b, w_c_ref[...], preferred_element_type=jnp.float32)
          + jnp.dot(k, w_k_ref[...], preferred_element_type=jnp.float32)
          + b_ref[...])
    o_ref[...] = h2.astype(o_ref.dtype)
    mask = None if m_real is None else _row_mask(tile_m, m_real)
    h_sum, h_sq = _partial_sums(h2, mask)
    st_ref[...] = jnp.concatenate([h_sum, h_sq], axis=0)[None]


def _make_apply_kernel(with_stats, m_real, tile_m):
    """BN+SiLU on previous activation, split-weight linear, optional stats."""
    def kernel(h_ref, cat_ref, sc_ref, sh_ref, w_ref, w_k_ref, b_ref, o_ref,
               *stats):
        v = _silu(h_ref[...].astype(jnp.float32) * sc_ref[...] + sh_ref[...])
        k = cat_ref[...].astype(jnp.float32)
        o = (jnp.dot(v, w_ref[...], preferred_element_type=jnp.float32)
             + jnp.dot(k, w_k_ref[...], preferred_element_type=jnp.float32)
             + b_ref[...])
        o_ref[...] = o.astype(o_ref.dtype)
        if with_stats:
            mask = None if m_real is None else _row_mask(tile_m, m_real)
            o_sum, o_sq = _partial_sums(o, mask)
            stats[0][...] = jnp.concatenate([o_sum, o_sq], axis=0)[None]
    return kernel


# ---------------------------------------------------------------------------
# Wrapper
# ---------------------------------------------------------------------------
def _bn_fold(total_sum, total_sq, count, gamma, beta):
    # Fold training-mode BN (biased variance, eps=1e-5) + affine into scale/shift.
    mean = total_sum / count
    var = jnp.maximum(total_sq / count - mean * mean, 0.0)  # single-pass, clamped
    scale = gamma * jax.lax.rsqrt(var + _EPS)
    shift = beta - mean * scale
    return scale[None, :], shift[None, :]


@functools.partial(jax.jit, static_argnames=("tile_m", "act_dtype"))
def fourier_embedding(x, category, params, *, tile_m=1024, act_dtype=jnp.float32):
    """x: (B, N, Cin), category: (B, N, Cd) -> (B, N, out_channels)."""
    B, N, Cin = x.shape
    Cd = category.shape[-1]
    M = B * N

    H = params["w1"].shape[0]          # ch0 // 2
    ch0 = 2 * H
    C1 = params["w2"].shape[0]
    C2 = params["w3"].shape[0]
    Co = params["w4"].shape[0]
    Hp = _round_up(H, _LANE)
    C1p = _round_up(C1, _LANE)
    C2p = _round_up(C2, _LANE)
    Cop = _round_up(Co, _LANE)

    tm = min(tile_m, _round_up(M, 8))
    M_pad = _round_up(M, tm)
    nt = M_pad // tm
    m_real = None if M_pad == M else M   # static: mask rows only when padded

    x2 = x.reshape(M, Cin)
    c2 = category.reshape(M, Cd)
    if M_pad != M:
        x2 = jnp.pad(x2, ((0, M_pad - M), (0, 0)))
        c2 = jnp.pad(c2, ((0, M_pad - M), (0, 0)))

    f32 = jnp.float32
    # Lane-padded, pre-transposed weights.  The [sin | cos | category] concat of
    # the PyTorch module becomes split row-blocks of each weight matrix.
    w1p = _pad2(params["w1"].T.astype(f32), Cin, Hp)              # (Cin, Hp)
    w2 = params["w2"].T.astype(f32)                               # (ch0+Cd, C1)
    w2s, w2c, w2k = (_pad2(w2[:H], Hp, C1p),
                     _pad2(w2[H:ch0], Hp, C1p),
                     _pad2(w2[ch0:], Cd, C1p))
    b2 = _pad2(params["b2"].astype(f32)[None, :], 1, C1p)
    w3 = params["w3"].T.astype(f32)                               # (C1+Cd, C2)
    w3h, w3k = _pad2(w3[:C1], C1p, C2p), _pad2(w3[C1:], Cd, C2p)
    b3 = _pad2(params["b3"].astype(f32)[None, :], 1, C2p)
    w4 = params["w4"].T.astype(f32)                               # (C2+Cd, Co)
    w4h, w4k = _pad2(w4[:C2], C2p, Cop), _pad2(w4[C2:], Cd, Cop)
    b4 = _pad2(params["b4"].astype(f32)[None, :], 1, Cop)

    # BN affine params, zero-padded so padded channels normalize to exactly 0
    # (gamma=0 -> scale=0, shift=0; note cos(0)=1 on padded columns is thus
    #  harmless).
    g1, be1 = params["g1"].astype(f32), params["be1"].astype(f32)
    g1s, be1s = _pad1(g1[:H], Hp), _pad1(be1[:H], Hp)
    g1c, be1c = _pad1(g1[H:], Hp), _pad1(be1[H:], Hp)
    g2 = _pad1(params["g2"].astype(f32), C1p)
    be2 = _pad1(params["be2"].astype(f32), C1p)
    g3 = _pad1(params["g3"].astype(f32), C2p)
    be3 = _pad1(params["be3"].astype(f32), C2p)

    count = f32(M)
    grid = (nt,)

    def act_spec(c):
        return pl.BlockSpec((tm, c), lambda i: (i, 0))

    def const_spec(a):
        return pl.BlockSpec(a.shape, lambda i, _nd=a.ndim: (0,) * _nd)

    def stats_spec(rows, c):
        return pl.BlockSpec((1, rows, c), lambda i: (i, 0, 0))

    cparams = pltpu.CompilerParams(
        dimension_semantics=("parallel",),       # per-tile work is independent
        vmem_limit_bytes=32 * 1024 * 1024,       # fits v5e/v6e/v7x scoped VMEM
    )

    # --- pass 1: partial BN1 stats only (Fourier features are recomputed in
    #             pass 2, never stored to HBM) -------------------------------
    st1 = pl.pallas_call(
        functools.partial(_stats1_kernel, m_real=m_real, tile_m=tm),
        grid=grid,
        in_specs=[act_spec(Cin), const_spec(w1p)],
        out_specs=stats_spec(4, Hp),
        out_shape=jax.ShapeDtypeStruct((nt, 4, Hp), f32),
        compiler_params=cparams,
    )(x2, w1p)
    st1 = jnp.sum(st1, axis=0)
    sc_s, sh_s = _bn_fold(st1[0], st1[2], count, g1s, be1s)
    sc_c, sh_c = _bn_fold(st1[1], st1[3], count, g1c, be1c)

    # --- pass 2: recompute Fourier features, BN1+SiLU, linear2, BN2 stats ----
    h2, st2 = pl.pallas_call(
        functools.partial(_layer2_kernel, m_real=m_real, tile_m=tm),
        grid=grid,
        in_specs=[act_spec(Cin), act_spec(Cd), const_spec(w1p),
                  const_spec(sc_s), const_spec(sh_s),
                  const_spec(sc_c), const_spec(sh_c),
                  const_spec(w2s), const_spec(w2c), const_spec(w2k),
                  const_spec(b2)],
        out_specs=[act_spec(C1p), stats_spec(2, C1p)],
        out_shape=[jax.ShapeDtypeStruct((M_pad, C1p), act_dtype),
                   jax.ShapeDtypeStruct((nt, 2, C1p), f32)],
        compiler_params=cparams,
    )(x2, c2, w1p, sc_s, sh_s, sc_c, sh_c, w2s, w2c, w2k, b2)
    st2 = jnp.sum(st2, axis=0)
    sc2, sh2 = _bn_fold(st2[0], st2[1], count, g2, be2)

    # --- pass 3: BN2+SiLU, linear3, BN3 stats ---------------------------------
    h3, st3 = pl.pallas_call(
        _make_apply_kernel(True, m_real, tm),
        grid=grid,
        in_specs=[act_spec(C1p), act_spec(Cd),
                  const_spec(sc2), const_spec(sh2),
                  const_spec(w3h), const_spec(w3k), const_spec(b3)],
        out_specs=[act_spec(C2p), stats_spec(2, C2p)],
        out_shape=[jax.ShapeDtypeStruct((M_pad, C2p), act_dtype),
                   jax.ShapeDtypeStruct((nt, 2, C2p), f32)],
        compiler_params=cparams,
    )(h2, c2, sc2, sh2, w3h, w3k, b3)
    st3 = jnp.sum(st3, axis=0)
    sc3, sh3 = _bn_fold(st3[0], st3[1], count, g3, be3)

    # --- pass 4: BN3+SiLU, linear4 (no stats needed) ---------------------------
    out = pl.pallas_call(
        _make_apply_kernel(False, m_real, tm),
        grid=grid,
        in_specs=[act_spec(C2p), act_spec(Cd),
                  const_spec(sc3), const_spec(sh3),
                  const_spec(w4h), const_spec(w4k), const_spec(b4)],
        out_specs=act_spec(Cop),
        out_shape=jax.ShapeDtypeStruct((M_pad, Cop), act_dtype),
        compiler_params=cparams,
    )(h3, c2, sc3, sh3, w4h, w4k, b4)

    return out[:M, :Co].reshape(B, N, Co).astype(x.dtype)


# ---------------------------------------------------------------------------
# Pure-JAX reference of the PyTorch forward (training-mode batch norm)
# ---------------------------------------------------------------------------
def _reference(x, category, params):
    B, N, _ = x.shape
    M = B * N
    xf = x.reshape(M, -1).astype(jnp.float32)
    cf = category.reshape(M, -1).astype(jnp.float32)

    def bn_silu(v, g, b):
        mean = jnp.mean(v, axis=0, keepdims=True)
        var = jnp.mean((v - mean) ** 2, axis=0, keepdims=True)
        vn = (v - mean) / jnp.sqrt(var + _EPS) * g + b
        return vn * jax.nn.sigmoid(vn)

    h = _TAU * (xf @ params["w1"].T)
    f = jnp.concatenate([jnp.sin(h), jnp.cos(h)], axis=-1)
    f = bn_silu(f, params["g1"], params["be1"])
    f = jnp.concatenate([f, cf], axis=-1) @ params["w2"].T + params["b2"]
    f = bn_silu(f, params["g2"], params["be2"])
    f = jnp.concatenate([f, cf], axis=-1) @ params["w3"].T + params["b3"]
    f = bn_silu(f, params["g3"], params["be3"])
    f = jnp.concatenate([f, cf], axis=-1) @ params["w4"].T + params["b4"]
    return f.reshape(B, N, -1)


def init_params(key, in_channels, ch, context_dims, out_channels=None, sigma=1.0):
    if out_channels is None:
        out_channels = ch[-1]
    assert ch[0] % 2 == 0
    ks = jax.random.split(key, 7)
    return {
        # linear: (ch0//2, in_channels), normal(0, sigma), no bias
        "w1": sigma * jax.random.normal(ks[0], (ch[0] // 2, in_channels), jnp.float32),
        # linear2/3/4: deterministic small random init (synthetic; no checkpoint)
        "w2": 0.1 * jax.random.normal(ks[1], (ch[1], ch[0] + context_dims), jnp.float32),
        "b2": 0.1 * jax.random.normal(ks[2], (ch[1],), jnp.float32),
        "w3": 0.1 * jax.random.normal(ks[3], (ch[2], ch[1] + context_dims), jnp.float32),
        "b3": 0.1 * jax.random.normal(ks[4], (ch[2],), jnp.float32),
        "w4": 0.1 * jax.random.normal(ks[5], (out_channels, ch[2] + context_dims), jnp.float32),
        "b4": 0.1 * jax.random.normal(ks[6], (out_channels,), jnp.float32),
        # BatchNorm affine params: PyTorch default init (gamma=1, beta=0)
        "g1": jnp.ones((ch[0],), jnp.float32), "be1": jnp.zeros((ch[0],), jnp.float32),
        "g2": jnp.ones((ch[1],), jnp.float32), "be2": jnp.zeros((ch[1],), jnp.float32),
        "g3": jnp.ones((ch[2],), jnp.float32), "be3": jnp.zeros((ch[2],), jnp.float32),
    }


if __name__ == "__main__":
    in_channels, ch, context_dims = 4, (32, 32, 32), 4
    key = jax.random.PRNGKey(0)
    kx, kc, kp = jax.random.split(key, 3)
    params = init_params(kp, in_channels, ch, context_dims, sigma=1.0)

    # Tolerance note: the kernel splits/pads the matmuls (vs the reference's
    # concatenated dots), so MXU default-precision rounding and accumulation
    # order differ slightly; 1e-2 comfortably covers that while still catching
    # any structural error.
    TOL = dict(atol=1e-2, rtol=1e-2)

    # Case 1: small shape, single tile.
    B, N = 2, 8
    x = jax.random.normal(kx, (B, N, in_channels), jnp.float32)
    cat = jax.random.normal(kc, (B, N, context_dims), jnp.float32)
    out = jax.block_until_ready(fourier_embedding(x, cat, params))
    ref = _reference(x, cat, params)
    assert out.shape == (B, N, ch[-1])
    assert jnp.allclose(out, ref, **TOL), "mismatch vs reference (single tile)"

    # Case 2: multi-tile grid with row masking (M=150 -> padded to 192, 3 tiles
    # of 64) — exercises the two-phase global BatchNorm across tiles.
    B2, N2 = 3, 50
    kx2, kc2 = jax.random.split(jax.random.PRNGKey(1))
    x2 = jax.random.normal(kx2, (B2, N2, in_channels), jnp.float32)
    cat2 = jax.random.normal(kc2, (B2, N2, context_dims), jnp.float32)
    out2 = jax.block_until_ready(fourier_embedding(x2, cat2, params, tile_m=64))
    ref2 = _reference(x2, cat2, params)
    assert out2.shape == (B2, N2, ch[-1])
    assert jnp.allclose(out2, ref2, **TOL), "mismatch vs reference (tiled+masked)"

    # Case 3: bf16 activation storage (halves HBM traffic for h2/h3/out;
    # compute and BN statistics stay f32).
    out_bf16 = jax.block_until_ready(
        fourier_embedding(x2, cat2, params, tile_m=64, act_dtype=jnp.bfloat16))
    assert out_bf16.shape == (B2, N2, ch[-1])
    assert bool(jnp.isfinite(out_bf16).all())

    print("KERNEL_OK")
</pallas_src>

<mosaic_0001>
module attributes {stable_mosaic.version = 11 : i64} {
  func.func @_stats1_kernel(%arg0: i32, %arg1: memref<16x4xf32, #tpu.memory_space<vmem>>, %arg2: memref<4x128xf32, #tpu.memory_space<vmem>>, %arg3: memref<1x4x128xf32, #tpu.memory_space<vmem>>) attributes {dimension_semantics = [#tpu.dimension_semantics<parallel>], iteration_bounds = array<i64: 1>, scalar_prefetch = 0 : i64, scratch_operands = 0 : i64, tpu.core_type = #tpu.core_type<tc>, window_params = [{transform_indices = @transform_0, window_bounds = array<i64: 16, 4>}, {pipeline_mode = #tpu.pipeline_mode<synchronous>, transform_indices = @transform_1, window_bounds = array<i64: 4, 128>}, {transform_indices = @transform_2, window_bounds = array<i64: 1, 4, 128>}]} {
    %c0 = arith.constant 0 : index
    %c0_0 = arith.constant 0 : index
    %0 = vector.load %arg1[%c0, %c0_0] : memref<16x4xf32, #tpu.memory_space<vmem>>, vector<16x4xf32>
    %c0_1 = arith.constant 0 : index
    %c0_2 = arith.constant 0 : index
    %1 = vector.load %arg2[%c0_1, %c0_2] : memref<4x128xf32, #tpu.memory_space<vmem>>, vector<4x128xf32>
    %cst = arith.constant dense<0.000000e+00> : vector<16x128xf32>
    %2 = tpu.matmul %0, %1, %cst {dimension_numbers = #tpu.dot_dimension_numbers<[1], [0], [0], [1], [0, 0, 1, 1], [], []>} : vector<16x4xf32>, vector<4x128xf32>, vector<16x128xf32> -> vector<16x128xf32>
    %cst_3 = arith.constant 6.28318548 : f32
    %3 = vector.broadcast %cst_3 : f32 to vector<16x128xf32>
    %4 = arith.mulf %3, %2 : vector<16x128xf32>
    %5 = math.sin %4 : vector<16x128xf32>
    %6 = math.cos %4 : vector<16x128xf32>
    %cst_4 = arith.constant dense<0.000000e+00> : vector<128xf32>
    %7 = vector.multi_reduction <add>, %5, %cst_4 [0] : vector<16x128xf32> to vector<128xf32>
    %8 = vector.shape_cast %7 : vector<128xf32> to vector<1x128xf32>
    %9 = arith.mulf %5, %5 : vector<16x128xf32>
    %cst_5 = arith.constant dense<0.000000e+00> : vector<128xf32>
    %10 = vector.multi_reduction <add>, %9, %cst_5 [0] : vector<16x128xf32> to vector<128xf32>
    %11 = vector.shape_cast %10 : vector<128xf32> to vector<1x128xf32>
    %cst_6 = arith.constant dense<0.000000e+00> : vector<128xf32>
    %12 = vector.multi_reduction <add>, %6, %cst_6 [0] : vector<16x128xf32> to vector<128xf32>
    %13 = vector.shape_cast %12 : vector<128xf32> to vector<1x128xf32>
    %14 = arith.mulf %6, %6 : vector<16x128xf32>
    %cst_7 = arith.constant dense<0.000000e+00> : vector<128xf32>
    %15 = vector.multi_reduction <add>, %14, %cst_7 [0] : vector<16x128xf32> to vector<128xf32>
    %16 = vector.shape_cast %15 : vector<128xf32> to vector<1x128xf32>
    %17 = tpu.concatenate %8, %13, %11, %16 in 0 : vector<1x128xf32>, vector<1x128xf32>, vector<1x128xf32>, vector<1x128xf32> -> vector<4x128xf32>
    %18 = vector.shape_cast %17 : vector<4x128xf32> to vector<1x4x128xf32>
    %c0_8 = arith.constant 0 : index
    %c0_9 = arith.constant 0 : index
    %c0_10 = arith.constant 0 : index
    %19 = vector.load %arg3[%c0_8, %c0_9, %c0_10] : memref<1x4x128xf32, #tpu.memory_space<vmem>>, vector<1x4x128xf32>
    tpu.vector_store %arg3[%c0_8, %c0_9, %c0_10], %18 {strides = array<i32>} : memref<1x4x128xf32, #tpu.memory_space<vmem>>, vector<1x4x128xf32>,
    return
  }
  func.func @transform_0(%arg0: i32) -> (i32, i32) {
    %c0_i32 = arith.constant 0 : i32
    %c0_i32_0 = arith.constant 0 : i32
    return %arg0, %c0_i32 : i32, i32
  }
  func.func @transform_1(%arg0: i32) -> (i32, i32) {
    %c0_i32 = arith.constant 0 : i32
    %c0_i32_0 = arith.constant 0 : i32
    %c0_i32_1 = arith.constant 0 : i32
    return %c0_i32, %c0_i32_0 : i32, i32
  }
  func.func @transform_2(%arg0: i32) -> (i32, i32, i32) {
    %c0_i32 = arith.constant 0 : i32
    %c0_i32_0 = arith.constant 0 : i32
    %c0_i32_1 = arith.constant 0 : i32
    return %arg0, %c0_i32, %c0_i32_0 : i32, i32, i32
  }
}

module attributes {stable_mosaic.version = 11 : i64} {
  func.func @kernel(%arg0: i32, %arg1: memref<16x128xf32, #tpu.memory_space<vmem>>, %arg2: memref<16x4xf32, #tpu.memory_space<vmem>>, %arg3: memref<1x128xf32, #tpu.memory_space<vmem>>, %arg4: memref<1x128xf32, #tpu.memory_space<vmem>>, %arg5: memref<128x128xf32, #tpu.memory_space<vmem>>, %arg6: memref<4x128xf32, #tpu.memory_space<vmem>>, %arg7: memref<1x128xf32, #tpu.memory_space<vmem>>, %arg8: memref<16x128xf32, #tpu.memory_space<vmem>>, %arg9: memref<1x2x128xf32, #tpu.memory_space<vmem>>) attributes {dimension_semantics = [#tpu.dimension_semantics<parallel>], iteration_bounds = array<i64: 1>, scalar_prefetch = 0 : i64, scratch_operands = 0 : i64, tpu.core_type = #tpu.core_type<tc>, window_params = [{transform_indices = @transform_0, window_bounds = array<i64: 16, 128>}, {transform_indices = @transform_1, window_bounds = array<i64: 16, 4>}, {pipeline_mode = #tpu.pipeline_mode<synchronous>, transform_indices = @transform_2, window_bounds = array<i64: 1, 128>}, {pipeline_mode = #tpu.pipeline_mode<synchronous>, transform_indices = @transform_3, window_bounds = array<i64: 1, 128>}, {pipeline_mode = #tpu.pipeline_mode<synchronous>, transform_indices = @transform_4, window_bounds = array<i64: 128, 128>}, {pipeline_mode = #tpu.pipeline_mode<synchronous>, transform_indices = @transform_5, window_bounds = array<i64: 4, 128>}, {pipeline_mode = #tpu.pipeline_mode<synchronous>, transform_indices = @transform_6, window_bounds = array<i64: 1, 128>}, {transform_indices = @transform_7, window_bounds = array<i64: 16, 128>}, {transform_indices = @transform_8, window_bounds = array<i64: 1, 2, 128>}]} {
    %c0 = arith.constant 0 : index
    %c0_0 = arith.constant 0 : index
    %0 = vector.load %arg1[%c0, %c0_0] : memref<16x128xf32, #tpu.memory_space<vmem>>, vector<16x128xf32>
    %c0_1 = arith.constant 0 : index
    %c0_2 = arith.constant 0 : index
    %1 = vector.load %arg3[%c0_1, %c0_2] : memref<1x128xf32, #tpu.memory_space<vmem>>, vector<1x128xf32>
    %2 = vector.broadcast %1 : vector<1x128xf32> to vector<16x128xf32>
    %3 = arith.mulf %0, %2 : vector<16x128xf32>
    %c0_3 = arith.constant 0 : index
    %c0_4 = arith.constant 0 : index
    %4 = vector.load %arg4[%c0_3, %c0_4] : memref<1x128xf32, #tpu.memory_space<vmem>>, vector<1x128xf32>
    %5 = vector.broadcast %4 : vector<1x128xf32> to vector<16x128xf32>
    %6 = arith.addf %3, %5 : vector<16x128xf32>
    %7 = arith.negf %6 : vector<16x128xf32>
    %8 = math.exp %7 : vector<16x128xf32>
    %cst = arith.constant 1.000000e+00 : f32
    %9 = vector.broadcast %cst : f32 to vector<16x128xf32>
    %10 = arith.addf %9, %8 : vector<16x128xf32>
    %11 = arith.divf %9, %10 : vector<16x128xf32>
    %12 = arith.mulf %6, %11 : vector<16x128xf32>
    %c0_5 = arith.constant 0 : index
    %c0_6 = arith.constant 0 : index
    %13 = vector.load %arg2[%c0_5, %c0_6] : memref<16x4xf32, #tpu.memory_space<vmem>>, vector<16x4xf32>
    %c0_7 = arith.constant 0 : index
    %c0_8 = arith.constant 0 : index
    %14 = vector.load %arg5[%c0_7, %c0_8] : memref<128x128xf32, #tpu.memory_space<vmem>>, vector<128x128xf32>
    %cst_9 = arith.constant dense<0.000000e+00> : vector<16x128xf32>
    %15 = tpu.matmul %12, %14, %cst_9 {dimension_numbers = #tpu.dot_dimension_numbers<[1], [0], [0], [1], [0, 0, 1, 1], [], []>} : vector<16x128xf32>, vector<128x128xf32>, vector<16x128xf32> -> vector<16x128xf32>
    %c0_10 = arith.constant 0 : index
    %c0_11 = arith.constant 0 : index
    %16 = vector.load %arg6[%c0_10, %c0_11] : memref<4x128xf32, #tpu.memory_space<vmem>>, vector<4x128xf32>
    %cst_12 = arith.constant dense<0.000000e+00> : vector<16x128xf32>
    %17 = tpu.matmul %13, %16, %cst_12 {dimension_numbers = #tpu.dot_dimension_numbers<[1], [0], [0], [1], [0, 0, 1, 1], [], []>} : vector<16x4xf32>, vector<4x128xf32>, vector<16x128xf32> -> vector<16x128xf32>
    %18 = arith.addf %15, %17 : vector<16x128xf32>
    %c0_13 = arith.constant 0 : index
    %c0_14 = arith.constant 0 : index
    %19 = vector.load %arg7[%c0_13, %c0_14] : memref<1x128xf32, #tpu.memory_space<vmem>>, vector<1x128xf32>
    %20 = vector.broadcast %19 : vector<1x128xf32> to vector<16x128xf32>
    %21 = arith.addf %18, %20 : vector<16x128xf32>
    %c0_15 = arith.constant 0 : index
    %c0_16 = arith.constant 0 : index
    %22 = vector.load %arg8[%c0_15, %c0_16] : memref<16x128xf32, #tpu.memory_space<vmem>>, vector<16x128xf32>
    tpu.vector_store %arg8[%c0_15, %c0_16], %21 {strides = array<i32>} : memref<16x128xf32, #tpu.memory_space<vmem>>, vector<16x128xf32>,
    %cst_17 = arith.constant dense<0.000000e+00> : vector<128xf32>
    %23 = vector.multi_reduction <add>, %21, %cst_17 [0] : vector<16x128xf32> to vector<128xf32>
    %24 = vector.shape_cast %23 : vector<128xf32> to vector<1x128xf32>
    %25 = arith.mulf %21, %21 : vector<16x128xf32>
    %cst_18 = arith.constant dense<0.000000e+00> : vector<128xf32>
    %26 = vector.multi_reduction <add>, %25, %cst_18 [0] : vector<16x128xf32> to vector<128xf32>
    %27 = vector.shape_cast %26 : vector<128xf32> to vector<1x128xf32>
    %28 = tpu.concatenate %24, %27 in 0 : vector<1x128xf32>, vector<1x128xf32> -> vector<2x128xf32>
    %29 = vector.shape_cast %28 : vector<2x128xf32> to vector<1x2x128xf32>
    %c0_19 = arith.constant 0 : index
    %c0_20 = arith.constant 0 : index
    %c0_21 = arith.constant 0 : index
    %30 = vector.load %arg9[%c0_19, %c0_20, %c0_21] : memref<1x2x128xf32, #tpu.memory_space<vmem>>, vector<1x2x128xf32>
    tpu.vector_store %arg9[%c0_19, %c0_20, %c0_21], %29 {strides = array<i32>} : memref<1x2x128xf32, #tpu.memory_space<vmem>>, vector<1x2x128xf32>,
    return
  }
  func.func @transform_0(%arg0: i32) -> (i32, i32) {
    %c0_i32 = arith.constant 0 : i32
    %c0_i32_0 = arith.constant 0 : i32
    return %arg0, %c0_i32 : i32, i32
  }
  func.func @transform_1(%arg0: i32) -> (i32, i32) {
    %c0_i32 = arith.constant 0 : i32
    %c0_i32_0 = arith.constant 0 : i32
    return %arg0, %c0_i32 : i32, i32
  }
  func.func @transform_2(%arg0: i32) -> (i32, i32) {
    %c0_i32 = arith.constant 0 : i32
    %c0_i32_0 = arith.constant 0 : i32
    %c0_i32_1 = arith.constant 0 : i32
    return %c0_i32, %c0_i32_0 : i32, i32
  }
  func.func @transform_3(%arg0: i32) -> (i32, i32) {
    %c0_i32 = arith.constant 0 : i32
    %c0_i32_0 = arith.constant 0 : i32
    %c0_i32_1 = arith.constant 0 : i32
    return %c0_i32, %c0_i32_0 : i32, i32
  }
  func.func @transform_4(%arg0: i32) -> (i32, i32) {
    %c0_i32 = arith.constant 0 : i32
    %c0_i32_0 = arith.constant 0 : i32
    %c0_i32_1 = arith.constant 0 : i32
    return %c0_i32, %c0_i32_0 : i32, i32
  }
  func.func @transform_5(%arg0: i32) -> (i32, i32) {
    %c0_i32 = arith.constant 0 : i32
    %c0_i32_0 = arith.constant 0 : i32
    %c0_i32_1 = arith.constant 0 : i32
    return %c0_i32, %c0_i32_0 : i32, i32
  }
  func.func @transform_6(%arg0: i32) -> (i32, i32) {
    %c0_i32 = arith.constant 0 : i32
    %c0_i32_0 = arith.constant 0 : i32
    %c0_i32_1 = arith.constant 0 : i32
    return %c0_i32, %c0_i32_0 : i32, i32
  }
  func.func @transform_7(%arg0: i32) -> (i32, i32) {
    %c0_i32 = arith.constant 0 : i32
    %c0_i32_0 = arith.constant 0 : i32
    return %arg0, %c0_i32 : i32, i32
  }
  func.func @transform_8(%arg0: i32) -> (i32, i32, i32) {
    %c0_i32 = arith.constant 0 : i32
    %c0_i32_0 = arith.constant 0 : i32
    %c0_i32_1 = arith.constant 0 : i32
    return %arg0, %c0_i32, %c0_i32_0 : i32, i32, i32
  }
}

module attributes {stable_mosaic.version = 11 : i64} {
  func.func @_layer2_kernel(%arg0: i32, %arg1: memref<16x4xf32, #tpu.memory_space<vmem>>, %arg2: memref<16x4xf32, #tpu.memory_space<vmem>>, %arg3: memref<4x128xf32, #tpu.memory_space<vmem>>, %arg4: memref<1x128xf32, #tpu.memory_space<vmem>>, %arg5: memref<1x128xf32, #tpu.memory_space<vmem>>, %arg6: memref<1x128xf32, #tpu.memory_space<vmem>>, %arg7: memref<1x128xf32, #tpu.memory_space<vmem>>, %arg8: memref<128x128xf32, #tpu.memory_space<vmem>>, %arg9: memref<128x128xf32, #tpu.memory_space<vmem>>, %arg10: memref<4x128xf32, #tpu.memory_space<vmem>>, %arg11: memref<1x128xf32, #tpu.memory_space<vmem>>, %arg12: memref<16x128xf32, #tpu.memory_space<vmem>>, %arg13: memref<1x2x128xf32, #tpu.memory_space<vmem>>) attributes {dimension_semantics = [#tpu.dimension_semantics<parallel>], iteration_bounds = array<i64: 1>, scalar_prefetch = 0 : i64, scratch_operands = 0 : i64, tpu.core_type = #tpu.core_type<tc>, window_params = [{transform_indices = @transform_0, window_bounds = array<i64: 16, 4>}, {transform_indices = @transform_1, window_bounds = array<i64: 16, 4>}, {pipeline_mode = #tpu.pipeline_mode<synchronous>, transform_indices = @transform_2, window_bounds = array<i64: 4, 128>}, {pipeline_mode = #tpu.pipeline_mode<synchronous>, transform_indices = @transform_3, window_bounds = array<i64: 1, 128>}, {pipeline_mode = #tpu.pipeline_mode<synchronous>, transform_indices = @transform_4, window_bounds = array<i64: 1, 128>}, {pipeline_mode = #tpu.pipeline_mode<synchronous>, transform_indices = @transform_5, window_bounds = array<i64: 1, 128>}, {pipeline_mode = #tpu.pipeline_mode<synchronous>, transform_indices = @transform_6, window_bounds = array<i64: 1, 128>}, {pipeline_mode = #tpu.pipeline_mode<synchronous>, transform_indices = @transform_7, window_bounds = array<i64: 128, 128>}, {pipeline_mode = #tpu.pipeline_mode<synchronous>, transform_indices = @transform_8, window_bounds = array<i64: 128, 128>}, {pipeline_mode = #tpu.pipeline_mode<synchronous>, transform_indices = @transform_9, window_bounds = array<i64: 4, 128>}, {pipeline_mode = #tpu.pipeline_mode<synchronous>, transform_indices = @transform_10, window_bounds = array<i64: 1, 128>}, {transform_indices = @transform_11, window_bounds = array<i64: 16, 128>}, {transform_indices = @transform_12, window_bounds = array<i64: 1, 2, 128>}]} {
    %c0 = arith.constant 0 : index
    %c0_0 = arith.constant 0 : index
    %0 = vector.load %arg1[%c0, %c0_0] : memref<16x4xf32, #tpu.memory_space<vmem>>, vector<16x4xf32>
    %c0_1 = arith.constant 0 : index
    %c0_2 = arith.constant 0 : index
    %1 = vector.load %arg3[%c0_1, %c0_2] : memref<4x128xf32, #tpu.memory_space<vmem>>, vector<4x128xf32>
    %cst = arith.constant dense<0.000000e+00> : vector<16x128xf32>
    %2 = tpu.matmul %0, %1, %cst {dimension_numbers = #tpu.dot_dimension_numbers<[1], [0], [0], [1], [0, 0, 1, 1], [], []>} : vector<16x4xf32>, vector<4x128xf32>, vector<16x128xf32> -> vector<16x128xf32>
    %cst_3 = arith.constant 6.28318548 : f32
    %3 = vector.broadcast %cst_3 : f32 to vector<16x128xf32>
    %4 = arith.mulf %3, %2 : vector<16x128xf32>
    %5 = math.sin %4 : vector<16x128xf32>
    %c0_4 = arith.constant 0 : index
    %c0_5 = arith.constant 0 : index
    %6 = vector.load %arg4[%c0_4, %c0_5] : memref<1x128xf32, #tpu.memory_space<vmem>>, vector<1x128xf32>
    %7 = vector.broadcast %6 : vector<1x128xf32> to vector<16x128xf32>
    %8 = arith.mulf %5, %7 : vector<16x128xf32>
    %c0_6 = arith.constant 0 : index
    %c0_7 = arith.constant 0 : index
    %9 = vector.load %arg5[%c0_6, %c0_7] : memref<1x128xf32, #tpu.memory_space<vmem>>, vector<1x128xf32>
    %10 = vector.broadcast %9 : vector<1x128xf32> to vector<16x128xf32>
    %11 = arith.addf %8, %10 : vector<16x128xf32>
    %12 = arith.negf %11 : vector<16x128xf32>
    %13 = math.exp %12 : vector<16x128xf32>
    %cst_8 = arith.constant 1.000000e+00 : f32
    %14 = vector.broadcast %cst_8 : f32 to vector<16x128xf32>
    %15 = arith.addf %14, %13 : vector<16x128xf32>
    %16 = arith.divf %14, %15 : vector<16x128xf32>
    %17 = arith.mulf %11, %16 : vector<16x128xf32>
    %18 = math.cos %4 : vector<16x128xf32>
    %c0_9 = arith.constant 0 : index
    %c0_10 = arith.constant 0 : index
    %19 = vector.load %arg6[%c0_9, %c0_10] : memref<1x128xf32, #tpu.memory_space<vmem>>, vector<1x128xf32>
    %20 = vector.broadcast %19 : vector<1x128xf32> to vector<16x128xf32>
    %21 = arith.mulf %18, %20 : vector<16x128xf32>
    %c0_11 = arith.constant 0 : index
    %c0_12 = arith.constant 0 : index
    %22 = vector.load %arg7[%c0_11, %c0_12] : memref<1x128xf32, #tpu.memory_space<vmem>>, vector<1x128xf32>
    %23 = vector.broadcast %22 : vector<1x128xf32> to vector<16x128xf32>
    %24 = arith.addf %21, %23 : vector<16x128xf32>
    %25 = arith.negf %24 : vector<16x128xf32>
    %26 = math.exp %25 : vector<16x128xf32>
    %cst_13 = arith.constant 1.000000e+00 : f32
    %27 = vector.broadcast %cst_13 : f32 to vector<16x128xf32>
    %28 = arith.addf %27, %26 : vector<16x128xf32>
    %29 = arith.divf %27, %28 : vector<16x128xf32>
    %30 = arith.mulf %24, %29 : vector<16x128xf32>
    %c0_14 = arith.constant 0 : index
    %c0_15 = arith.constant 0 : index
    %31 = vector.load %arg2[%c0_14, %c0_15] : memref<16x4xf32, #tpu.memory_space<vmem>>, vector<16x4xf32>
    %c0_16 = arith.constant 0 : index
    %c0_17 = arith.constant 0 : index
    %32 = vector.load %arg8[%c0_16, %c0_17] : memref<128x128xf32, #tpu.memory_space<vmem>>, vector<128x128xf32>
    %cst_18 = arith.constant dense<0.000000e+00> : vector<16x128xf32>
    %33 = tpu.matmul %17, %32, %cst_18 {dimension_numbers = #tpu.dot_dimension_numbers<[1], [0], [0], [1], [0, 0, 1, 1], [], []>} : vector<16x128xf32>, vector<128x128xf32>, vector<16x128xf32> -> vector<16x128xf32>
    %c0_19 = arith.constant 0 : index
    %c0_20 = arith.constant 0 : index
    %34 = vector.load %arg9[%c0_19, %c0_20] : memref<128x128xf32, #tpu.memory_space<vmem>>, vector<128x128xf32>
    %cst_21 = arith.constant dense<0.000000e+00> : vector<16x128xf32>
    %35 = tpu.matmul %30, %34, %cst_21 {dimension_numbers = #tpu.dot_dimension_numbers<[1], [0], [0], [1], [0, 0, 1, 1], [], []>} : vector<16x128xf32>, vector<128x128xf32>, vector<16x128xf32> -> vector<16x128xf32>
    %36 = arith.addf %33, %35 : vector<16x128xf32>
    %c0_22 = arith.constant 0 : index
    %c0_23 = arith.constant 0 : index
    %37 = vector.load %arg10[%c0_22, %c0_23] : memref<4x128xf32, #tpu.memory_space<vmem>>, vector<4x128xf32>
    %cst_24 = arith.constant dense<0.000000e+00> : vector<16x128xf32>
    %38 = tpu.matmul %31, %37, %cst_24 {dimension_numbers = #tpu.dot_dimension_numbers<[1], [0], [0], [1], [0, 0, 1, 1], [], []>} : vector<16x4xf32>, vector<4x128xf32>, vector<16x128xf32> -> vector<16x128xf32>
    %39 = arith.addf %36, %38 : vector<16x128xf32>
    %c0_25 = arith.constant 0 : index
    %c0_26 = arith.constant 0 : index
    %40 = vector.load %arg11[%c0_25, %c0_26] : memref<1x128xf32, #tpu.memory_space<vmem>>, vector<1x128xf32>
    %41 = vector.broadcast %40 : vector<1x128xf32> to vector<16x128xf32>
    %42 = arith.addf %39, %41 : vector<16x128xf32>
    %c0_27 = arith.constant 0 : index
    %c0_28 = arith.constant 0 : index
    %43 = vector.load %arg12[%c0_27, %c0_28] : memref<16x128xf32, #tpu.memory_space<vmem>>, vector<16x128xf32>
    tpu.vector_store %arg12[%c0_27, %c0_28], %42 {strides = array<i32>} : memref<16x128xf32, #tpu.memory_space<vmem>>, vector<16x128xf32>,
    %cst_29 = arith.constant dense<0.000000e+00> : vector<128xf32>
    %44 = vector.multi_reduction <add>, %42, %cst_29 [0] : vector<16x128xf32> to vector<128xf32>
    %45 = vector.shape_cast %44 : vector<128xf32> to vector<1x128xf32>
    %46 = arith.mulf %42, %42 : vector<16x128xf32>
    %cst_30 = arith.constant dense<0.000000e+00> : vector<128xf32>
    %47 = vector.multi_reduction <add>, %46, %cst_30 [0] : vector<16x128xf32> to vector<128xf32>
    %48 = vector.shape_cast %47 : vector<128xf32> to vector<1x128xf32>
    %49 = tpu.concatenate %45, %48 in 0 : vector<1x128xf32>, vector<1x128xf32> -> vector<2x128xf32>
    %50 = vector.shape_cast %49 : vector<2x128xf32> to vector<1x2x128xf32>
    %c0_31 = arith.constant 0 : index
    %c0_32 = arith.constant 0 : index
    %c0_33 = arith.constant 0 : index
    %51 = vector.load %arg13[%c0_31, %c0_32, %c0_33] : memref<1x2x128xf32, #tpu.memory_space<vmem>>, vector<1x2x128xf32>
    tpu.vector_store %arg13[%c0_31, %c0_32, %c0_33], %50 {strides = array<i32>} : memref<1x2x128xf32, #tpu.memory_space<vmem>>, vector<1x2x128xf32>,
    return
  }
  func.func @transform_0(%arg0: i32) -> (i32, i32) {
    %c0_i32 = arith.constant 0 : i32
    %c0_i32_0 = arith.constant 0 : i32
    return %arg0, %c0_i32 : i32, i32
  }
  func.func @transform_1(%arg0: i32) -> (i32, i32) {
    %c0_i32 = arith.constant 0 : i32
    %c0_i32_0 = arith.constant 0 : i32
    return %arg0, %c0_i32 : i32, i32
  }
  func.func @transform_2(%arg0: i32) -> (i32, i32) {
    %c0_i32 = arith.constant 0 : i32
    %c0_i32_0 = arith.constant 0 : i32
    %c0_i32_1 = arith.constant 0 : i32
    return %c0_i32, %c0_i32_0 : i32, i32
  }
  func.func @transform_3(%arg0: i32) -> (i32, i32) {
    %c0_i32 = arith.constant 0 : i32
    %c0_i32_0 = arith.constant 0 : i32
    %c0_i32_1 = arith.constant 0 : i32
    return %c0_i32, %c0_i32_0 : i32, i32
  }
  func.func @transform_4(%arg0: i32) -> (i32, i32) {
    %c0_i32 = arith.constant 0 : i32
    %c0_i32_0 = arith.constant 0 : i32
    %c0_i32_1 = arith.constant 0 : i32
    return %c0_i32, %c0_i32_0 : i32, i32
  }
  func.func @transform_5(%arg0: i32) -> (i32, i32) {
    %c0_i32 = arith.constant 0 : i32
    %c0_i32_0 = arith.constant 0 : i32
    %c0_i32_1 = arith.constant 0 : i32
    return %c0_i32, %c0_i32_0 : i32, i32
  }
  func.func @transform_6(%arg0: i32) -> (i32, i32) {
    %c0_i32 = arith.constant 0 : i32
    %c0_i32_0 = arith.constant 0 : i32
    %c0_i32_1 = arith.constant 0 : i32
    return %c0_i32, %c0_i32_0 : i32, i32
  }
  func.func @transform_7(%arg0: i32) -> (i32, i32) {
    %c0_i32 = arith.constant 0 : i32
    %c0_i32_0 = arith.constant 0 : i32
    %c0_i32_1 = arith.constant 0 : i32
    return %c0_i32, %c0_i32_0 : i32, i32
  }
  func.func @transform_8(%arg0: i32) -> (i32, i32) {
    %c0_i32 = arith.constant 0 : i32
    %c0_i32_0 = arith.constant 0 : i32
    %c0_i32_1 = arith.constant 0 : i32
    return %c0_i32, %c0_i32_0 : i32, i32
  }
  func.func @transform_9(%arg0: i32) -> (i32, i32) {
    %c0_i32 = arith.constant 0 : i32
    %c0_i32_0 = arith.constant 0 : i32
    %c0_i32_1 = arith.constant 0 : i32
    return %c0_i32, %c0_i32_0 : i32, i32
  }
  func.func @transform_10(%arg0: i32) -> (i32, i32) {
    %c0_i32 = arith.constant 0 : i32
    %c0_i32_0 = arith.constant 0 : i32
    %c0_i32_1 = arith.constant 0 : i32
    return %c0_i32, %c0_i32_0 : i32, i32
  }
  func.func @transform_11(%arg0: i32) -> (i32, i32) {
    %c0_i32 = arith.constant 0 : i32
    %c0_i32_0 = arith.constant 0 : i32
    return %arg0, %c0_i32 : i32, i32
  }
  func.func @transform_12(%arg0: i32) -> (i32, i32, i32) {
    %c0_i32 = arith.constant 0 : i32
    %c0_i32_0 = arith.constant 0 : i32
    %c0_i32_1 = arith.constant 0 : i32
    return %arg0, %c0_i32, %c0_i32_0 : i32, i32, i32
  }
}

module attributes {stable_mosaic.version = 11 : i64} {
  func.func @kernel(%arg0: i32, %arg1: memref<16x128xf32, #tpu.memory_space<vmem>>, %arg2: memref<16x4xf32, #tpu.memory_space<vmem>>, %arg3: memref<1x128xf32, #tpu.memory_space<vmem>>, %arg4: memref<1x128xf32, #tpu.memory_space<vmem>>, %arg5: memref<128x128xf32, #tpu.memory_space<vmem>>, %arg6: memref<4x128xf32, #tpu.memory_space<vmem>>, %arg7: memref<1x128xf32, #tpu.memory_space<vmem>>, %arg8: memref<16x128xf32, #tpu.memory_space<vmem>>) attributes {dimension_semantics = [#tpu.dimension_semantics<parallel>], iteration_bounds = array<i64: 1>, scalar_prefetch = 0 : i64, scratch_operands = 0 : i64, tpu.core_type = #tpu.core_type<tc>, window_params = [{transform_indices = @transform_0, window_bounds = array<i64: 16, 128>}, {transform_indices = @transform_1, window_bounds = array<i64: 16, 4>}, {pipeline_mode = #tpu.pipeline_mode<synchronous>, transform_indices = @transform_2, window_bounds = array<i64: 1, 128>}, {pipeline_mode = #tpu.pipeline_mode<synchronous>, transform_indices = @transform_3, window_bounds = array<i64: 1, 128>}, {pipeline_mode = #tpu.pipeline_mode<synchronous>, transform_indices = @transform_4, window_bounds = array<i64: 128, 128>}, {pipeline_mode = #tpu.pipeline_mode<synchronous>, transform_indices = @transform_5, window_bounds = array<i64: 4, 128>}, {pipeline_mode = #tpu.pipeline_mode<synchronous>, transform_indices = @transform_6, window_bounds = array<i64: 1, 128>}, {transform_indices = @transform_7, window_bounds = array<i64: 16, 128>}]} {
    %c0 = arith.constant 0 : index
    %c0_0 = arith.constant 0 : index
    %0 = vector.load %arg1[%c0, %c0_0] : memref<16x128xf32, #tpu.memory_space<vmem>>, vector<16x128xf32>
    %c0_1 = arith.constant 0 : index
    %c0_2 = arith.constant 0 : index
    %1 = vector.load %arg3[%c0_1, %c0_2] : memref<1x128xf32, #tpu.memory_space<vmem>>, vector<1x128xf32>
    %2 = vector.broadcast %1 : vector<1x128xf32> to vector<16x128xf32>
    %3 = arith.mulf %0, %2 : vector<16x128xf32>
    %c0_3 = arith.constant 0 : index
    %c0_4 = arith.constant 0 : index
    %4 = vector.load %arg4[%c0_3, %c0_4] : memref<1x128xf32, #tpu.memory_space<vmem>>, vector<1x128xf32>
    %5 = vector.broadcast %4 : vector<1x128xf32> to vector<16x128xf32>
    %6 = arith.addf %3, %5 : vector<16x128xf32>
    %7 = arith.negf %6 : vector<16x128xf32>
    %8 = math.exp %7 : vector<16x128xf32>
    %cst = arith.constant 1.000000e+00 : f32
    %9 = vector.broadcast %cst : f32 to vector<16x128xf32>
    %10 = arith.addf %9, %8 : vector<16x128xf32>
    %11 = arith.divf %9, %10 : vector<16x128xf32>
    %12 = arith.mulf %6, %11 : vector<16x128xf32>
    %c0_5 = arith.constant 0 : index
    %c0_6 = arith.constant 0 : index
    %13 = vector.load %arg2[%c0_5, %c0_6] : memref<16x4xf32, #tpu.memory_space<vmem>>, vector<16x4xf32>
    %c0_7 = arith.constant 0 : index
    %c0_8 = arith.constant 0 : index
    %14 = vector.load %arg5[%c0_7, %c0_8] : memref<128x128xf32, #tpu.memory_space<vmem>>, vector<128x128xf32>
    %cst_9 = arith.constant dense<0.000000e+00> : vector<16x128xf32>
    %15 = tpu.matmul %12, %14, %cst_9 {dimension_numbers = #tpu.dot_dimension_numbers<[1], [0], [0], [1], [0, 0, 1, 1], [], []>} : vector<16x128xf32>, vector<128x128xf32>, vector<16x128xf32> -> vector<16x128xf32>
    %c0_10 = arith.constant 0 : index
    %c0_11 = arith.constant 0 : index
    %16 = vector.load %arg6[%c0_10, %c0_11] : memref<4x128xf32, #tpu.memory_space<vmem>>, vector<4x128xf32>
    %cst_12 = arith.constant dense<0.000000e+00> : vector<16x128xf32>
    %17 = tpu.matmul %13, %16, %cst_12 {dimension_numbers = #tpu.dot_dimension_numbers<[1], [0], [0], [1], [0, 0, 1, 1], [], []>} : vector<16x4xf32>, vector<4x128xf32>, vector<16x128xf32> -> vector<16x128xf32>
    %18 = arith.addf %15, %17 : vector<16x128xf32>
    %c0_13 = arith.constant 0 : index
    %c0_14 = arith.constant 0 : index
    %19 = vector.load %arg7[%c0_13, %c0_14] : memref<1x128xf32, #tpu.memory_space<vmem>>, vector<1x128xf32>
    %20 = vector.broadcast %19 : vector<1x128xf32> to vector<16x128xf32>
    %21 = arith.addf %18, %20 : vector<16x128xf32>
    %c0_15 = arith.constant 0 : index
    %c0_16 = arith.constant 0 : index
    %22 = vector.load %arg8[%c0_15, %c0_16] : memref<16x128xf32, #tpu.memory_space<vmem>>, vector<16x128xf32>
    tpu.vector_store %arg8[%c0_15, %c0_16], %21 {strides = array<i32>} : memref<16x128xf32, #tpu.memory_space<vmem>>, vector<16x128xf32>,
    return
  }
  func.func @transform_0(%arg0: i32) -> (i32, i32) {
    %c0_i32 = arith.constant 0 : i32
    %c0_i32_0 = arith.constant 0 : i32
    return %arg0, %c0_i32 : i32, i32
  }
  func.func @transform_1(%arg0: i32) -> (i32, i32) {
    %c0_i32 = arith.constant 0 : i32
    %c0_i32_0 = arith.constant 0 : i32
    return %arg0, %c0_i32 : i32, i32
  }
  func.func @transform_2(%arg0: i32) -> (i32, i32) {
    %c0_i32 = arith.constant 0 : i32
    %c0_i32_0 = arith.constant 0 : i32
    %c0_i32_1 = arith.constant 0 : i32
    return %c0_i32, %c0_i32_0 : i32, i32
  }
  func.func @transform_3(%arg0: i32) -> (i32, i32) {
    %c0_i32 = arith.constant 0 : i32
    %c0_i32_0 = arith.constant 0 : i32
    %c0_i32_1 = arith.constant 0 : i32
    return %c0_i32, %c0_i32_0 : i32, i32
  }
  func.func @transform_4(%arg0: i32) -> (i32, i32) {
    %c0_i32 = arith.constant 0 : i32
    %c0_i32_0 = arith.constant 0 : i32
    %c0_i32_1 = arith.constant 0 : i32
    return %c0_i32, %c0_i32_0 : i32, i32
  }
  func.func @transform_5(%arg0: i32) -> (i32, i32) {
    %c0_i32 = arith.constant 0 : i32
    %c0_i32_0 = arith.constant 0 : i32
    %c0_i32_1 = arith.constant 0 : i32
    return %c0_i32, %c0_i32_0 : i32, i32
  }
  func.func @transform_6(%arg0: i32) -> (i32, i32) {
    %c0_i32 = arith.constant 0 : i32
    %c0_i32_0 = arith.constant 0 : i32
    %c0_i32_1 = arith.constant 0 : i32
    return %c0_i32, %c0_i32_0 : i32, i32
  }
  func.func @transform_7(%arg0: i32) -> (i32, i32) {
    %c0_i32 = arith.constant 0 : i32
    %c0_i32_0 = arith.constant 0 : i32
    return %arg0, %c0_i32 : i32, i32
  }
}

</mosaic_0001>

<bundles_post_ra>
// kernel: fourier_embedding.4
= control target key start
LH: loop header
LB: loop body
LE: loop exit
PB: predicated region body
PF: predicated region fallthrough
CT: control target
= control target key end

     0   :  { %vm21_vm0 = vcmask 1043456   ;;  %vm14_vm1 = vcmask 31744   ;;  %v608_v27 = vmov 683565275   ;;  %v609_v31 = vmov 2475754826   ;;  %s707_s1 = inlined_call_operand.vmem [shape: f32[4,128], index: 1, kind: input, shape index: {}]   ;;  %s708_s0 = inlined_call_operand.vmem [shape: f32[16,4], index: 0, kind: input, shape index: {}]   ;;  %s709_s2 = inlined_call_operand.vmem [shape: f32[1,4,128], index: 2, kind: output, shape index: {}]  }
   0x1   :  { %v13_v0 = vld [vmem:[%s707_s1] sm:$0xf]  ;;  %v12_v2 = vld [vmem:[%s708_s0 + $0x8] sm:$0xff]  ;;  %v610_v33 = vmov 2131351028  }
   0x2   :  { %v11_v1 = vld [vmem:[%s708_s0] sm:$0xff]  ;;  %581 = vmatprep.subr.msk.mxu0 %vm21_vm0, %v13_v0  ;;  %v611_v35 = vmov 2102212464   ;;  %v612_v37 = vmov 920167782  }
   0x3   :  { %583 = vmatprep.mubr.msk.f32.mxu0 %vm14_vm1, %v11_v1  ;;  %582 = vmatpush3.msk.msra.mxu0 %vm21_vm0, %v13_v0  ;;  %v613_v44 = vmov 1326507024  }
   0x4   :  { %584 = vmatmul.mubr.msk.f32.vlgmr.msra.gmra.mrb[0].mxu0 %vm14_vm1, %v12_v2 }
  0xd7   :  { %v585_v3 = vpop.f32.mrb[0].mxu0 }
  0xd8   :  { %v638_v4 = vmul.f32 6.2831855, %v585_v3  ;;  %v91_v5 = vpop.f32.mrb[1].mxu0 }
  0xd9   :  { %v640_v6 = vmul.f32 6.2831855, %v91_v5 }
  0xda   :  { %v206_v7 = vand.u32 2147483647, %v638_v4  ;;  %v209_v8 = vand.u32 2139095040, %v638_v4  ;;  %vm208_vm0 = vcmp.lt.s32.totalorder %v638_v4, 0 }
  0xdb   :  { %v105_v9 = vand.u32 2139095040, %v640_v6  ;;  %v102_v12 = vand.u32 2147483647, %v640_v6 }
  0xdc   :  { %v210_v10 = vshrl.u32 %v209_v8, 23  ;;  %v213_v11 = vand.u32 8388607, %v206_v7  ;;  %vm207_vm1 = vcmp.le.f32.partialorder %v206_v7, 0.7853982 }
  0xdd   :  { %v106_v13 = vshrl.u32 %v105_v9, 23  ;;  %v650_v18 = vand.u32 8388607, %v102_v12 }
  0xde   :  { %v566_v14 = vadd.s32 4294967169, %v210_v10  ;;  %v214_v17 = vor.u32 8388608, %v213_v11 }
  0xdf   :  { %v562_v15 = vadd.s32 4294967169, %v106_v13  ;;  %v110_v25 = vor.u32 8388608, %v650_v18 }
  0xe0   :  { %v216_v16 = vadd.s32 1, %v566_v14  ;;  %v652_v24 = vshll.u32 %v214_v17, 8 }
  0xe1   :  { %v112_v19 = vadd.s32 1, %v562_v15 }
  0xe2   :  { %vm217_vm2 = vcmp.gt.s32.totalorder %v216_v16, 0 }
  0xe3   :  { %v218_v20 = vsel %vm217_vm2, %v216_v16, 0  ;;  %vm113_vm3 = vcmp.gt.s32.totalorder %v112_v19, 0  ;;  %vm104_vm2 = vcmp.lt.s32.totalorder %v640_v6, 0 }
  0xe4   :  { %v219_v21 = vshrl.u32 %v218_v20, 5  ;;  %v220_v22 = vand.u32 31, %v218_v20  ;;  %v114_v23 = vsel %vm113_vm3, %v112_v19, 0  ;;  %v150_v19 = vshll.u32 %v110_v25, 8 }
  0xe5   :  { %v655_v29 = vshrl.u32 %v114_v23, 5  ;;  %v116_v30 = vand.u32 31, %v114_v23  ;;  %vm103_vm3 = vcmp.le.f32.partialorder %v102_v12, 0.7853982 }
  0xe6   :  { %v221_v26 = vsub.s32 32, %v220_v22  ;;  %v223_v28 = vshll.u32 %v608_v27, %v220_v22  ;;  %v226_v32 = vshll.u32 %v609_v31, %v220_v22  ;;  %v229_v34 = vshll.u32 %v610_v33, %v220_v22 }
  0xe7   :  { %v232_v36 = vshll.u32 %v611_v35, %v220_v22  ;;  %v235_v38 = vshll.u32 %v612_v37, %v220_v22  ;;  %vm238_vm4 = vcmp.lt.s32.totalorder %v219_v21, 1  ;;  %vm239_vm5 = vcmp.lt.s32.totalorder %v219_v21, 2 }
  0xe8   :  { %v224_v39 = vshrl.u32 %v609_v31, %v221_v26  ;;  %v227_v40 = vshrl.u32 %v610_v33, %v221_v26  ;;  %v230_v41 = vshrl.u32 %v611_v35, %v221_v26  ;;  %v222_v42 = vshrl.u32 %v608_v27, %v221_v26 }
  0xe9   :  { %v233_v43 = vshrl.u32 %v612_v37, %v221_v26  ;;  %v236_v45 = vshrl.u32 %v613_v44, %v221_v26  ;;  %v117_v49 = vsub.s32 32, %v116_v30  ;;  %vm240_vm6 = vcmp.lt.s32.totalorder %v219_v21, 3 }
  0xea   :  { %v225_v46 = vor.u32 %v224_v39, %v223_v28  ;;  %v228_v47 = vor.u32 %v227_v40, %v226_v32  ;;  %v231_v48 = vor.u32 %v230_v41, %v229_v34  ;;  %vm241_vm7 = vcmp.lt.s32.totalorder %v219_v21, 4 }
  0xeb   :  { %v234_v50 = vor.u32 %v233_v43, %v232_v36  ;;  %v237_v51 = vor.u32 %v236_v45, %v235_v38  ;;  %v119_v59 = vshll.u32 %v608_v27, %v116_v30  ;;  %v120_v62 = vshrl.u32 %v609_v31, %v117_v49 }
  0xec   :  { %v242_v52 = vsel %vm238_vm4, %v222_v42, %v225_v46  ;;  %v243_v53 = vsel %vm241_vm7, %v231_v48, 2102212464  ;;  %v246_v54 = vsel %vm238_vm4, %v225_v46, %v228_v47  ;;  %v250_v55 = vsel %vm238_vm4, %v228_v47, %v231_v48 }
  0xed   :  { %v244_v56 = vsel %vm240_vm6, %v228_v47, %v243_v53  ;;  %v247_v57 = vsel %vm241_vm7, %v234_v50, 920167782  ;;  %v251_v58 = vsel %vm241_vm7, %v237_v51, 1326507024  ;;  %v122_v63 = vshll.u32 %v609_v31, %v116_v30 }
  0xee   :  { %v248_v60 = vsel %vm240_vm6, %v231_v48, %v247_v57  ;;  %v252_v61 = vsel %vm240_vm6, %v234_v50, %v251_v58  ;;  %v245_v0 = vsel %vm239_vm5, %v242_v52, %v244_v56  ;;  %v123_v3 = vshrl.u32 %v610_v33, %v117_v49 }
  0xef   :  { %v249_v1 = vsel %vm239_vm5, %v246_v54, %v248_v60  ;;  %v253_v2 = vsel %vm239_vm5, %v250_v55, %v252_v61  ;;  %v121_v11 = vor.u32 %v120_v62, %v119_v59  ;;  %v125_v14 = vshll.u32 %v610_v33, %v116_v30 }
  0xf0   :  { %v664_v5 = vmul.u32.u64.low %v652_v24, %v253_v2  ;;  %v665_v8 = vmul.u32.u64.high %v652_v24, %v253_v2, %v664_v5  ;;  %v668_v9 = vmul.u32.u64.low %v652_v24, %v249_v1  ;;  %v669_v10 = vmul.u32.u64.high %v652_v24, %v249_v1, %v668_v9 }
  0xf1   :  { %v124_v13 = vor.u32 %v123_v3, %v122_v63  ;;  %v126_v15 = vshrl.u32 %v611_v35, %v117_v49  ;;  %v128_v16 = vshll.u32 %v611_v35, %v116_v30  ;;  %v129_v17 = vshrl.u32 %v612_v37, %v117_v49 }
  0xf2   :  { %v132_v18 = vshrl.u32 %v613_v44, %v117_v49  ;;  %v261_v20 = vmul.u32 %v652_v24, %v245_v0  ;;  %v118_v21 = vshrl.u32 %v608_v27, %v117_v49  ;;  %v131_v23 = vshll.u32 %v612_v37, %v116_v30 }
  0xf3   :  { %v127_v22 = vor.u32 %v126_v15, %v125_v14  ;;  %vm263_vm8 = vc.u32 %v665_v8, %v668_v9  ;;  %v264_v26 = vadd.s32 1, %v669_v10  ;;  %v130_v28 = vor.u32 %v129_v17, %v128_v16 }
  0xf4   :  { %vm134_vm9 = vcmp.lt.s32.totalorder %v655_v29, 1  ;;  %v133_v31 = vor.u32 %v132_v18, %v131_v23  ;;  %vm136_vm10 = vcmp.lt.s32.totalorder %v655_v29, 3  ;;  %vm137_vm11 = vcmp.lt.s32.totalorder %v655_v29, 4 }
  0xf5   :  { %v142_v32 = vsel %vm134_vm9, %v121_v11, %v124_v13  ;;  %v265_v25 = vsel %vm263_vm8, %v264_v26, %v669_v10  ;;  %v139_v33 = vsel %vm137_vm11, %v127_v22, 2102212464  ;;  %v143_v24 = vsel %vm137_vm11, %v130_v28, 920167782 }
  0xf6   :  { %v146_v27 = vsel %vm134_vm9, %v124_v13, %v127_v22  ;;  %v266_v34 = vadd.s32 %v265_v25, %v261_v20  ;;  %vm135_vm12 = vcmp.lt.s32.totalorder %v655_v29, 2  ;;  %v144_v30 = vsel %vm136_vm10, %v127_v22, %v143_v24 }
  0xf7   :  { %v147_v35 = vsel %vm137_vm11, %v133_v31, 1326507024  ;;  %v138_v36 = vsel %vm134_vm9, %v118_v21, %v121_v11  ;;  %v140_v37 = vsel %vm136_vm10, %v124_v13, %v139_v33  ;;  %v145_v38 = vsel %vm135_vm12, %v142_v32, %v144_v30 }
  0xf8   :  { %v148_v39 = vsel %vm136_vm10, %v130_v28, %v147_v35  ;;  %v267_v40 = vadd.s32 536870912, %v266_v34  ;;  %v679_v42 = vmul.u32.u64.low %v150_v19, %v145_v38  ;;  %v680_v43 = vmul.u32.u64.high %v150_v19, %v145_v38, %v679_v42 }
  0xf9   :  { %v149_v41 = vsel %vm135_vm12, %v146_v27, %v148_v39  ;;  %v141_v47 = vsel %vm135_vm12, %v138_v36, %v140_v37  ;;  %v262_v63 = vadd.s32 %v668_v9, %v665_v8  ;;  %vm298_vm10 = vweird.f32 %v638_v4 }
  0xfa   :  { %v682_v44 = vmul.u32.u64.low %v150_v19, %v149_v41  ;;  %v683_v45 = vmul.u32.u64.high %v150_v19, %v149_v41, %v682_v44  ;;  %v268_v46 = vshrl.u32 %v267_v40, 30  ;;  %v160_v49 = vadd.s32 1, %v680_v43 }
  0xfb   :  { %v157_v29 = vmul.u32 %v150_v19, %v141_v47  ;;  %vm194_vm11 = vweird.f32 %v640_v6 }
  0xfc   :  { %v269_v48 = vshll.u32 %v268_v46, 30  ;;  %vm159_vm13 = vc.u32 %v683_v45, %v679_v42  ;;  %v158_v20 = vadd.s32 %v679_v42, %v683_v45  ;;  %v292_v9 = vsub.s32 4, %v268_v46 }
  0xfd   :  { %v161_v51 = vsel %vm159_vm13, %v160_v49, %v680_v43 }
  0xfe   :  { %v270_v50 = vsub.s32 %v266_v34, %v269_v48  ;;  %v162_v52 = vadd.s32 %v161_v51, %v157_v29  ;;  %v293_v24 = vsel %vm208_vm0, %v292_v9, %v268_v46 }
  0xff   :  { %v295_v30 = vsel %vm207_vm1, 0, %v293_v24 }
 0x100   :  { %v272_v53 = vsub.s32 0, %v270_v50  ;;  %v163_v54 = vadd.s32 536870912, %v162_v52  ;;  %v299_v39 = vadd.s32 3, %v295_v30  ;;  %v506_v43 = vand.u32 3, %v295_v30 }
 0x102   :  { %v567_v55 = vmin.u32 %v272_v53, %v270_v50  ;;  %v164_v56 = vshrl.u32 %v163_v54, 30  ;;  %v300_v42 = vand.u32 3, %v299_v39  ;;  %vm508_vm5 = vcmp.eq.s32.totalorder %v506_v43, 0 }
 0x103   :  { %vm511_vm6 = vcmp.eq.s32.totalorder %v506_v43, 2  ;;  %vm507_vm9 = vcmp.lt.s32.totalorder %v506_v43, 2 }
 0x104   :  { %v274_v57 = vclz %v567_v55  ;;  %v165_v58 = vshll.u32 %v164_v56, 30  ;;  %v188_v38 = vsub.s32 4, %v164_v56  ;;  %vm305_vm4 = vcmp.eq.s32.totalorder %v300_v42, 2 }
 0x105   :  { %vm302_vm7 = vcmp.eq.s32.totalorder %v300_v42, 0  ;;  %vm301_vm8 = vcmp.lt.s32.totalorder %v300_v42, 2 }
 0x106   :  { %v568_v59 = vadd.s32 4294967294, %v274_v57  ;;  %v166_v60 = vsub.s32 %v162_v52, %v165_v58  ;;  %v189_v41 = vsel %vm104_vm2, %v188_v38, %v164_v56 }
 0x107   :  { %v191_v46 = vsel %vm103_vm3, 0, %v189_v41 }
 0x108   :  { %vm569_vm14 = vcmp.lt.s32.totalorder %v568_v59, 0  ;;  %v168_v62 = vsub.s32 0, %v166_v60  ;;  %v195_v12 = vadd.s32 3, %v191_v46  ;;  %v403_v58 = vand.u32 3, %v191_v46 }
 0x109   :  { %v277_v61 = vsel %vm569_vm14, 0, %v568_v59 }
 0x10a   :  { %v278_v0 = vsub.s32 32, %v277_v61  ;;  %v282_v1 = vsub.s32 4294967266, %v277_v61  ;;  %v563_v2 = vmin.u32 %v168_v62, %v166_v60  ;;  %v279_v3 = vshll.u32 %v270_v50, %v277_v61 }
 0x10b   :  { %v196_v57 = vand.u32 3, %v195_v12  ;;  %vm408_vm13 = vcmp.eq.s32.totalorder %v403_v58, 2 }
 0x10c   :  { %v280_v5 = vshrl.u32 %v262_v63, %v278_v0  ;;  %v283_v10 = vadd.s32 127, %v282_v1  ;;  %v170_v11 = vclz %v563_v2 }
 0x10d   :  { %vm201_vm12 = vcmp.eq.s32.totalorder %v196_v57, 2  ;;  %vm198_vm14 = vcmp.eq.s32.totalorder %v196_v57, 0 }
 0x10e   :  { %v281_v13 = vor.u32 %v280_v5, %v279_v3  ;;  %v284_v14 = vshll.u32 %v283_v10, 23  ;;  %v564_v15 = vadd.s32 4294967294, %v170_v11 }
 0x110   :  { %v285_v16 = vor.u32 4788187, %v284_v14  ;;  %vm565_vm15 = vcmp.lt.s32.totalorder %v564_v15, 0  ;;  %v288_v18 = vcvt.s32.f32 %v281_v13 }
 0x111   :  { %v173_v19 = vsel %vm565_vm15, 0, %v564_v15  ;;  %vm405_vm15 = vcmp.eq.s32.totalorder %v403_v58, 0 }
 0x112   :  { %v286_v17 = vand.u32 2147483647, %v285_v16  ;;  %v174_v21 = vsub.s32 32, %v173_v19  ;;  %v178_v22 = vsub.s32 4294967266, %v173_v19  ;;  %v175_v23 = vshll.u32 %v166_v60, %v173_v19 }
 0x114   :  { %v289_v8 = vmul.f32 %v288_v18, %v286_v17  ;;  %v176_v26 = vshrl.u32 %v158_v20, %v174_v21  ;;  %v179_v28 = vadd.s32 127, %v178_v22 }
 0x116   :  { %v290_v31 = vxor.u32 2147483648, %v289_v8  ;;  %v177_v32 = vor.u32 %v176_v26, %v175_v23  ;;  %v180_v25 = vshll.u32 %v179_v28, 23 }
 0x118   :  { %v291_v33 = vsel %vm208_vm0, %v290_v31, %v289_v8  ;;  %v181_v34 = vor.u32 4788187, %v180_v25  ;;  %v184_v36 = vcvt.s32.f32 %v177_v32  ;;  %vm197_vm0 = vcmp.lt.s32.totalorder %v196_v57, 2 }
 0x119   :  { %v294_v27 = vsel %vm207_vm1, %v638_v4, %v291_v33  ;;  %vm404_vm1 = vcmp.lt.s32.totalorder %v403_v58, 2 }
 0x11a   :  { %600 = vcosq.f32 %v294_v27  ;;  %v182_v35 = vand.u32 2147483647, %v181_v34 }
 0x11b   :  { %602 = vsinq.f32 %v294_v27 }
 0x11c   :  { %v185_v37 = vmul.f32 %v184_v36, %v182_v35 }
 0x11e   :  { %v186_v40 = vxor.u32 2147483648, %v185_v37 }
 0x120   :  { %v187_v7 = vsel %vm104_vm2, %v186_v40, %v185_v37  ;;  %vm548_vm2 = vcmask 1040384  }
 0x121   :  { %v190_v44 = vsel %vm103_vm3, %v640_v6, %v187_v7  ;;  %vm550_vm3 = vcmask 1041408  }
 0x122   :  { %604 = vcosq.f32 %v190_v44 }
 0x123   :  { %606 = vsinq.f32 %v190_v44 }
 0x124   :  { %v601_v45 = vpop.eup %600 }
 0x125   :  { %v603_v47 = vpop.eup %602  ;;  %v306_v48 = vxor.u32 2147483648, %v601_v45 }
 0x126   :  { %v303_v49 = vxor.u32 2147483648, %v603_v47 }
 0x127   :  { %v307_v29 = vsel %vm305_vm4, %v306_v48, %v603_v47  ;;  %v513_v50 = vsel %vm511_vm6, %v306_v48, %v603_v47  ;;  %vm552_vm4 = vcmask 1042432  }
 0x128   :  { %v304_v51 = vsel %vm302_vm7, %v601_v45, %v303_v49  ;;  %v510_v52 = vsel %vm508_vm5, %v601_v45, %v303_v49 }
 0x129   :  { %v308_v53 = vsel %vm301_vm8, %v304_v51, %v307_v29  ;;  %v514_v54 = vsel %vm507_vm9, %v510_v52, %v513_v50 }
 0x12a   :  { %v309_v55 = vsel %vm298_vm10, nan, %v308_v53  ;;  %v515_v56 = vsel %vm298_vm10, nan, %v514_v54 }
 0x12b   :  { %v524_v2 = vmul.f32 %v309_v55, %v309_v55  ;;  %v540_v3 = vmul.f32 %v515_v56, %v515_v56 }
 0x12c   :  { %v605_v59 = vpop.eup %604 }
 0x12d   :  { %v607_v60 = vpop.eup %606  ;;  %v202_v61 = vxor.u32 2147483648, %v605_v59 }
 0x12e   :  { %v199_v62 = vxor.u32 2147483648, %v607_v60 }
 0x12f   :  { %v203_v63 = vsel %vm201_vm12, %v202_v61, %v607_v60  ;;  %v410_v0 = vsel %vm408_vm13, %v202_v61, %v607_v60 }
 0x130   :  { %v200_v4 = vsel %vm198_vm14, %v605_v59, %v199_v62  ;;  %v407_v1 = vsel %vm405_vm15, %v605_v59, %v199_v62 }
 0x131   :  { %v204_v5 = vsel %vm197_vm0, %v200_v4, %v203_v63  ;;  %v411_v10 = vsel %vm404_vm1, %v407_v1, %v410_v0 }
 0x132   :  { %v205_v11 = vsel %vm194_vm11, nan, %v204_v5  ;;  %v412_v13 = vsel %vm194_vm11, nan, %v411_v10 }
 0x133   :  { %v516_v14 = vadd.f32 %v309_v55, %v205_v11  ;;  %v523_v15 = vmul.f32 %v205_v11, %v205_v11  ;;  %v532_v16 = vadd.f32 %v515_v56, %v412_v13  ;;  %v539_v17 = vmul.f32 %v412_v13, %v412_v13 }
 0x135   :  { %v517_v18 = vrot.slane %v516_v14, 4  ;;  %v525_v19 = vadd.f32 %v524_v2, %v523_v15  ;;  %v533_v20 = vrot.slane %v532_v16, 4  ;;  %v541_v21 = vadd.f32 %v540_v3, %v539_v17 }
 0x137   :  { %v518_v22 = vadd.f32 %v517_v18, %v516_v14  ;;  %v526_v8 = vrot.slane %v525_v19, 4  ;;  %v534_v9 = vadd.f32 %v533_v20, %v532_v16  ;;  %v542_v23 = vrot.slane %v541_v21, 4 }
 0x139   :  { %v519_v26 = vrot.slane %v518_v22, 2  ;;  %v527_v28 = vadd.f32 %v526_v8, %v525_v19  ;;  %v535_v31 = vrot.slane %v534_v9, 2  ;;  %v543_v32 = vadd.f32 %v542_v23, %v541_v21 }
 0x13b   :  { %v520_v25 = vadd.f32 %v519_v26, %v518_v22  ;;  %v528_v33 = vrot.slane %v527_v28, 2  ;;  %v536_v6 = vadd.f32 %v535_v31, %v534_v9  ;;  %v544_v24 = vrot.slane %v543_v32, 2 }
 0x13d   :  { %v521_v27 = vrot.slane %v520_v25, 1  ;;  %v529_v34 = vadd.f32 %v528_v33, %v527_v28  ;;  %v537_v30 = vrot.slane %v536_v6, 1  ;;  %v545_v35 = vadd.f32 %v544_v24, %v543_v32 }
 0x13f   :  { %v522_v36 = vadd.f32 %v521_v27, %v520_v25  ;;  %v530_v37 = vrot.slane %v529_v34, 1  ;;  %v538_v38 = vadd.f32 %v537_v30, %v536_v6  ;;  %v546_v39 = vrot.slane %v545_v35, 1 }
 0x141   :  { %v531_v40 = vadd.f32 %v530_v37, %v529_v34  ;;  %v547_v7 = vadd.f32 %v546_v39, %v545_v35  ;;  %v549_v41 = vsel %vm548_vm2, %v522_v36, %v538_v38 }
 0x143   :  { %v551_v42 = vsel %vm550_vm3, %v549_v41, %v531_v40 }
 0x144   :  { %v553_v43 = vsel %vm552_vm4, %v551_v42, %v547_v7 }
 0x145   :  { %554 = vst [vmem:[%s709_s2] sm:$0xf] %v553_v43 }

// kernel: fourier_embedding.6
= control target key start
LH: loop header
LB: loop body
LE: loop exit
PB: predicated region body
PF: predicated region fallthrough
CT: control target
= control target key end

     0   :  { %vm88_vm0 = vcmask 1043456   ;;  %vm81_vm1 = vcmask 31744   ;;  %vm269_vm2 = vcmask 1040384   ;;  %s521_s4 = inlined_call_operand.vmem [shape: f32[128,128], index: 4, kind: input, shape index: {}]   ;;  %s522_s5 = inlined_call_operand.vmem [shape: f32[4,128], index: 5, kind: input, shape index: {}]   ;;  %s523_s1 = inlined_call_operand.vmem [shape: f32[16,4], index: 1, kind: input, shape index: {}]   ;;  %s524_s0 = inlined_call_operand.vmem [shape: f32[16,128], index: 0, kind: input, shape index: {}]   ;;  %s525_s2 = inlined_call_operand.vmem [shape: f32[1,128], index: 2, kind: input, shape index: {}]   ;;  %s526_s3 = inlined_call_operand.vmem [shape: f32[1,128], index: 3, kind: input, shape index: {}]   ;;  %s527_s6 = inlined_call_operand.vmem [shape: f32[1,128], index: 6, kind: input, shape index: {}]   ;;  %s528_s7 = inlined_call_operand.vmem [shape: f32[16,128], index: 7, kind: output, shape index: {0}]   ;;  %s529_s8 = inlined_call_operand.vmem [shape: f32[1,2,128], index: 8, kind: output, shape index: {1}]  }
   0x1   :  { %v64_v0 = vld [vmem:[%s521_s4] sm:$0xff]  ;;  %v65_v1 = vld [vmem:[%s521_s4 + $0x8] sm:$0xff]  ;;  %v66_v2 = vld [vmem:[%s521_s4 + $0x10] sm:$0xff] }
   0x2   :  { %v349_v3 = vpack.c.bf16 %v65_v1, %v64_v0  ;;  %v67_v4 = vld [vmem:[%s521_s4 + $0x18] sm:$0xff]  ;;  %v68_v6 = vld [vmem:[%s521_s4 + $0x20] sm:$0xff]  ;;  %v69_v7 = vld [vmem:[%s521_s4 + $0x28] sm:$0xff] }
   0x3   :  { %v353_v5 = vpack.c.bf16 %v67_v4, %v66_v2  ;;  %v70_v8 = vld [vmem:[%s521_s4 + $0x30] sm:$0xff]  ;;  %v357_v9 = vpack.c.bf16 %v69_v7, %v68_v6  ;;  %v71_v10 = vld [vmem:[%s521_s4 + $0x38] sm:$0xff]  ;;  %v80_v11 = vld [vmem:[%s522_s5] sm:$0xf] }
   0x4   :  { %350 = vmatprep.subr.bf16.mxu0 %v349_v3  ;;  %v62_v12 = vld [vmem:[%s523_s1] sm:$0xff]  ;;  %309 = vmatprep.subr.msk.mxu1 %vm88_vm0, %v80_v11  ;;  %v63_v13 = vld [vmem:[%s523_s1 + $0x8] sm:$0xff]  ;;  %v361_v20 = vpack.c.bf16 %v71_v10, %v70_v8  ;;  %v74_v28 = vld [vmem:[%s521_s4 + $0x50] sm:$0xff] }
   0x5   :  { %352 = vmatpush3.bf16.msra.mxu0 %v349_v3  ;;  %311 = vmatprep.mubr.msk.f32.mxu1 %vm81_vm1, %v62_v12  ;;  %v28_v14 = vld [vmem:[%s524_s0] sm:$0xff]  ;;  %v29_v15 = vld [vmem:[%s524_s0 + $0x8] sm:$0xff]  ;;  %v75_v29 = vld [vmem:[%s521_s4 + $0x58] sm:$0xff] }
   0x6   :  { %354 = vmatprep.subr.bf16.mxu0 %v353_v5  ;;  %310 = vmatpush3.msk.msra.mxu1 %vm88_vm0, %v80_v11  ;;  %v280_v16 = vld [vmem:[%s525_s2] ss:$0 sm:$0xff]  ;;  %v73_v22 = vld [vmem:[%s521_s4 + $0x48] sm:$0xff]  ;;  %v369_v30 = vpack.c.bf16 %v75_v29, %v74_v28  ;;  %v78_v34 = vld [vmem:[%s521_s4 + $0x70] sm:$0xff] }
   0x7   :  { %v281_v17 = vld [vmem:[%s526_s3] ss:$0 sm:$0xff]  ;;  %312 = vmatmul.mubr.msk.f32.vlgmr.msra.gmra.mrb[0].mxu1 %vm81_vm1, %v63_v13  ;;  %v37_v18 = vmul.f32 %v280_v16, %v28_v14  ;;  %v38_v19 = vmul.f32 %v280_v16, %v29_v15  ;;  %v77_v32 = vld [vmem:[%s521_s4 + $0x68] sm:$0xff]  ;;  %v79_v35 = vld [vmem:[%s521_s4 + $0x78] sm:$0xff] }
   0x8   :  { %v72_v21 = vld [vmem:[%s521_s4 + $0x40] sm:$0xff]  ;;  %v377_v38 = vpack.c.bf16 %v79_v35, %v78_v34 }
   0x9   :  { %356 = vmatpush3.bf16.msra.mxu0 %v353_v5  ;;  %v46_v23 = vadd.f32 %v281_v17, %v37_v18  ;;  %v47_v24 = vadd.f32 %v281_v17, %v38_v19  ;;  %v365_v27 = vpack.c.bf16 %v73_v22, %v72_v21  ;;  %v76_v31 = vld [vmem:[%s521_s4 + $0x60] sm:$0xff] }
   0xa   :  { %358 = vmatprep.subr.bf16.mxu0 %v357_v9  ;;  %v373_v33 = vpack.c.bf16 %v77_v32, %v76_v31  ;;  %v287_v48 = vld [vmem:[%s527_s6] ss:$0 sm:$0xff] }
   0xb   :  { %v282_v25 = vmul.f32 -1.442695, %v46_v23  ;;  %v283_v26 = vmul.f32 -1.442695, %v47_v24 }
   0xd   :  { %360 = vmatpush3.bf16.msra.mxu0 %v357_v9  ;;  %383 = vpow2.f32 %v282_v25 }
   0xe   :  { %362 = vmatprep.subr.bf16.mxu0 %v361_v20  ;;  %385 = vpow2.f32 %v283_v26 }
  0x11   :  { %364 = vmatpush3.bf16.msra.mxu0 %v361_v20 }
  0x12   :  { %366 = vmatprep.subr.bf16.mxu0 %v365_v27 }
  0x15   :  { %368 = vmatpush3.bf16.msra.mxu0 %v365_v27 }
  0x16   :  { %370 = vmatprep.subr.bf16.mxu0 %v369_v30 }
  0x17   :  { %v384_v36 = vpop.eup %383 }
  0x18   :  { %v386_v37 = vpop.eup %385  ;;  %v54_v39 = vadd.f32 1.0, %v384_v36 }
  0x19   :  { %372 = vmatpush3.bf16.msra.mxu0 %v369_v30  ;;  %v55_v40 = vadd.f32 1.0, %v386_v37 }
  0x1a   :  { %374 = vmatprep.subr.bf16.mxu0 %v373_v33  ;;  %387 = vrcp.f32 %v54_v39 }
  0x1b   :  { %389 = vrcp.f32 %v55_v40 }
  0x1d   :  { %376 = vmatpush3.bf16.msra.mxu0 %v373_v33 }
  0x1e   :  { %378 = vmatprep.subr.bf16.mxu0 %v377_v38 }
  0x21   :  { %380 = vmatpush3.bf16.msra.mxu0 %v377_v38 }
  0x24   :  { %v388_v41 = vpop.eup %387 }
  0x25   :  { %v390_v42 = vpop.eup %389  ;;  %v60_v43 = vmul.f32 %v388_v41, %v46_v23 }
  0x26   :  { %v61_v44 = vmul.f32 %v390_v42, %v47_v24 }
  0x27   :  { %346 = vmatprep.mubr.f32.mxu0 %v60_v43 }
  0x28   :  { %347 = vmatmul.mubr.f32.vlgmr.msra.gmra.mrb[0].mxu0 %v61_v44 }
  0xda   :  { %v313_v45 = vpop.f32.mrb[0].mxu1 }
  0xdb   :  { %v158_v46 = vpop.f32.mrb[1].mxu1 }
  0xfb   :  { %v348_v47 = vpop.f32.mrb[0].mxu0 }
  0xfc   :  { %v239_v49 = vadd.f32 %v348_v47, %v313_v45  ;;  %v233_v50 = vpop.f32.mrb[1].mxu0 }
  0xfd   :  { %v234_v51 = vadd.f32 %v233_v50, %v158_v46 }
  0xfe   :  { %v250_v52 = vadd.f32 %v287_v48, %v239_v49 }
  0xff   :  { %v249_v53 = vadd.f32 %v287_v48, %v234_v51 }
 0x100   :  { %252 = vst [vmem:[%s528_s7 + $0x8] sm:$0xff] %v250_v52  ;;  %v261_v54 = vmul.f32 %v250_v52, %v250_v52 }
 0x101   :  { %251 = vst [vmem:[%s528_s7] sm:$0xff] %v249_v53  ;;  %v253_v55 = vadd.f32 %v250_v52, %v249_v53  ;;  %v260_v56 = vmul.f32 %v249_v53, %v249_v53 }
 0x103   :  { %v254_v57 = vrot.slane %v253_v55, 4  ;;  %v262_v58 = vadd.f32 %v261_v54, %v260_v56 }
 0x105   :  { %v255_v59 = vadd.f32 %v254_v57, %v253_v55  ;;  %v263_v60 = vrot.slane %v262_v58, 4 }
 0x107   :  { %v256_v61 = vrot.slane %v255_v59, 2  ;;  %v264_v62 = vadd.f32 %v263_v60, %v262_v58 }
 0x109   :  { %v257_v63 = vadd.f32 %v256_v61, %v255_v59  ;;  %v265_v0 = vrot.slane %v264_v62, 2 }
 0x10b   :  { %v258_v1 = vrot.slane %v257_v63, 1  ;;  %v266_v2 = vadd.f32 %v265_v0, %v264_v62 }
 0x10d   :  { %v267_v3 = vrot.slane %v266_v2, 1  ;;  %v259_v4 = vadd.f32 %v258_v1, %v257_v63 }
 0x10f   :  { %v268_v5 = vadd.f32 %v267_v3, %v266_v2 }
 0x111   :  { %v270_v6 = vsel %vm269_vm2, %v259_v4, %v268_v5 }
 0x112   :  { %271 = vst [vmem:[%s529_s8] sm:$0x3] %v270_v6 }

// kernel: fourier_embedding.7
= control target key start
LH: loop header
LB: loop body
LE: loop exit
PB: predicated region body
PF: predicated region fallthrough
CT: control target
= control target key end

     0   :  { %vm86_vm0 = vcmask 1043456   ;;  %vm79_vm1 = vcmask 31744   ;;  %s488_s4 = inlined_call_operand.vmem [shape: f32[128,128], index: 4, kind: input, shape index: {}]   ;;  %s489_s5 = inlined_call_operand.vmem [shape: f32[4,128], index: 5, kind: input, shape index: {}]   ;;  %s490_s1 = inlined_call_operand.vmem [shape: f32[16,4], index: 1, kind: input, shape index: {}]   ;;  %s491_s0 = inlined_call_operand.vmem [shape: f32[16,128], index: 0, kind: input, shape index: {}]   ;;  %s492_s2 = inlined_call_operand.vmem [shape: f32[1,128], index: 2, kind: input, shape index: {}]   ;;  %s493_s3 = inlined_call_operand.vmem [shape: f32[1,128], index: 3, kind: input, shape index: {}]   ;;  %s494_s6 = inlined_call_operand.vmem [shape: f32[1,128], index: 6, kind: input, shape index: {}]   ;;  %s495_s7 = inlined_call_operand.vmem [shape: f32[16,128], index: 7, kind: output, shape index: {}]  }
   0x1   :  { %v62_v0 = vld [vmem:[%s488_s4] sm:$0xff]  ;;  %v63_v1 = vld [vmem:[%s488_s4 + $0x8] sm:$0xff]  ;;  %v64_v2 = vld [vmem:[%s488_s4 + $0x10] sm:$0xff] }
   0x2   :  { %v324_v3 = vpack.c.bf16 %v63_v1, %v62_v0  ;;  %v65_v4 = vld [vmem:[%s488_s4 + $0x18] sm:$0xff]  ;;  %v66_v6 = vld [vmem:[%s488_s4 + $0x20] sm:$0xff]  ;;  %v67_v7 = vld [vmem:[%s488_s4 + $0x28] sm:$0xff] }
   0x3   :  { %v328_v5 = vpack.c.bf16 %v65_v4, %v64_v2  ;;  %v68_v8 = vld [vmem:[%s488_s4 + $0x30] sm:$0xff]  ;;  %v332_v9 = vpack.c.bf16 %v67_v7, %v66_v6  ;;  %v69_v10 = vld [vmem:[%s488_s4 + $0x38] sm:$0xff]  ;;  %v78_v11 = vld [vmem:[%s489_s5] sm:$0xf] }
   0x4   :  { %325 = vmatprep.subr.bf16.mxu0 %v324_v3  ;;  %v60_v12 = vld [vmem:[%s490_s1] sm:$0xff]  ;;  %284 = vmatprep.subr.msk.mxu1 %vm86_vm0, %v78_v11  ;;  %v61_v13 = vld [vmem:[%s490_s1 + $0x8] sm:$0xff]  ;;  %v336_v20 = vpack.c.bf16 %v69_v10, %v68_v8  ;;  %v72_v28 = vld [vmem:[%s488_s4 + $0x50] sm:$0xff] }
   0x5   :  { %327 = vmatpush3.bf16.msra.mxu0 %v324_v3  ;;  %286 = vmatprep.mubr.msk.f32.mxu1 %vm79_vm1, %v60_v12  ;;  %v26_v14 = vld [vmem:[%s491_s0] sm:$0xff]  ;;  %v27_v15 = vld [vmem:[%s491_s0 + $0x8] sm:$0xff]  ;;  %v73_v29 = vld [vmem:[%s488_s4 + $0x58] sm:$0xff] }
   0x6   :  { %329 = vmatprep.subr.bf16.mxu0 %v328_v5  ;;  %285 = vmatpush3.msk.msra.mxu1 %vm86_vm0, %v78_v11  ;;  %v255_v16 = vld [vmem:[%s492_s2] ss:$0 sm:$0xff]  ;;  %v71_v22 = vld [vmem:[%s488_s4 + $0x48] sm:$0xff]  ;;  %v344_v30 = vpack.c.bf16 %v73_v29, %v72_v28  ;;  %v76_v34 = vld [vmem:[%s488_s4 + $0x70] sm:$0xff] }
   0x7   :  { %v256_v17 = vld [vmem:[%s493_s3] ss:$0 sm:$0xff]  ;;  %287 = vmatmul.mubr.msk.f32.vlgmr.msra.gmra.mrb[0].mxu1 %vm79_vm1, %v61_v13  ;;  %v35_v18 = vmul.f32 %v255_v16, %v26_v14  ;;  %v36_v19 = vmul.f32 %v255_v16, %v27_v15  ;;  %v75_v32 = vld [vmem:[%s488_s4 + $0x68] sm:$0xff]  ;;  %v77_v35 = vld [vmem:[%s488_s4 + $0x78] sm:$0xff] }
   0x8   :  { %v70_v21 = vld [vmem:[%s488_s4 + $0x40] sm:$0xff]  ;;  %v352_v38 = vpack.c.bf16 %v77_v35, %v76_v34 }
   0x9   :  { %331 = vmatpush3.bf16.msra.mxu0 %v328_v5  ;;  %v44_v23 = vadd.f32 %v256_v17, %v35_v18  ;;  %v45_v24 = vadd.f32 %v256_v17, %v36_v19  ;;  %v340_v27 = vpack.c.bf16 %v71_v22, %v70_v21  ;;  %v74_v31 = vld [vmem:[%s488_s4 + $0x60] sm:$0xff] }
   0xa   :  { %333 = vmatprep.subr.bf16.mxu0 %v332_v9  ;;  %v348_v33 = vpack.c.bf16 %v75_v32, %v74_v31  ;;  %v262_v48 = vld [vmem:[%s494_s6] ss:$0 sm:$0xff] }
   0xb   :  { %v257_v25 = vmul.f32 -1.442695, %v44_v23  ;;  %v258_v26 = vmul.f32 -1.442695, %v45_v24 }
   0xd   :  { %335 = vmatpush3.bf16.msra.mxu0 %v332_v9  ;;  %358 = vpow2.f32 %v257_v25 }
   0xe   :  { %337 = vmatprep.subr.bf16.mxu0 %v336_v20  ;;  %360 = vpow2.f32 %v258_v26 }
  0x11   :  { %339 = vmatpush3.bf16.msra.mxu0 %v336_v20 }
  0x12   :  { %341 = vmatprep.subr.bf16.mxu0 %v340_v27 }
  0x15   :  { %343 = vmatpush3.bf16.msra.mxu0 %v340_v27 }
  0x16   :  { %345 = vmatprep.subr.bf16.mxu0 %v344_v30 }
  0x17   :  { %v359_v36 = vpop.eup %358 }
  0x18   :  { %v361_v37 = vpop.eup %360  ;;  %v52_v39 = vadd.f32 1.0, %v359_v36 }
  0x19   :  { %347 = vmatpush3.bf16.msra.mxu0 %v344_v30  ;;  %v53_v40 = vadd.f32 1.0, %v361_v37 }
  0x1a   :  { %349 = vmatprep.subr.bf16.mxu0 %v348_v33  ;;  %362 = vrcp.f32 %v52_v39 }
  0x1b   :  { %364 = vrcp.f32 %v53_v40 }
  0x1d   :  { %351 = vmatpush3.bf16.msra.mxu0 %v348_v33 }
  0x1e   :  { %353 = vmatprep.subr.bf16.mxu0 %v352_v38 }
  0x21   :  { %355 = vmatpush3.bf16.msra.mxu0 %v352_v38 }
  0x24   :  { %v363_v41 = vpop.eup %362 }
  0x25   :  { %v365_v42 = vpop.eup %364  ;;  %v58_v43 = vmul.f32 %v363_v41, %v44_v23 }
  0x26   :  { %v59_v44 = vmul.f32 %v365_v42, %v45_v24 }
  0x27   :  { %321 = vmatprep.mubr.f32.mxu0 %v58_v43 }
  0x28   :  { %322 = vmatmul.mubr.f32.vlgmr.msra.gmra.mrb[0].mxu0 %v59_v44 }
  0xda   :  { %v288_v45 = vpop.f32.mrb[0].mxu1 }
  0xdb   :  { %v156_v46 = vpop.f32.mrb[1].mxu1 }
  0xfb   :  { %v323_v47 = vpop.f32.mrb[0].mxu0 }
  0xfc   :  { %v237_v49 = vadd.f32 %v323_v47, %v288_v45  ;;  %v231_v50 = vpop.f32.mrb[1].mxu0 }
  0xfd   :  { %v232_v51 = vadd.f32 %v231_v50, %v156_v46 }
  0xfe   :  { %v248_v52 = vadd.f32 %v262_v48, %v237_v49 }
  0xff   :  { %v247_v53 = vadd.f32 %v262_v48, %v232_v51 }
 0x100   :  { %250 = vst [vmem:[%s495_s7 + $0x8] sm:$0xff] %v248_v52 }
 0x101   :  { %249 = vst [vmem:[%s495_s7] sm:$0xff] %v247_v53 }

// kernel: fourier_embedding.5
= control target key start
LH: loop header
LB: loop body
LE: loop exit
PB: predicated region body
PF: predicated region fallthrough
CT: control target
= control target key end

     0   :  { %vm50_vm0 = vcmask 1043456   ;;  %vm43_vm1 = vcmask 31744   ;;  %s1460_s2 = inlined_call_operand.vmem [shape: f32[4,128], index: 2, kind: input, shape index: {}]   ;;  %s1461_s0 = inlined_call_operand.vmem [shape: f32[16,4], index: 0, kind: input, shape index: {}]   ;;  %s1462_s7 = inlined_call_operand.vmem [shape: f32[128,128], index: 7, kind: input, shape index: {}]   ;;  %s1463_s8 = inlined_call_operand.vmem [shape: f32[128,128], index: 8, kind: input, shape index: {}]   ;;  %s1464_s9 = inlined_call_operand.vmem [shape: f32[4,128], index: 9, kind: input, shape index: {}]   ;;  %s1465_s5 = inlined_call_operand.vmem [shape: f32[1,128], index: 5, kind: input, shape index: {}]   ;;  %s1466_s3 = inlined_call_operand.vmem [shape: f32[1,128], index: 3, kind: input, shape index: {}]   ;;  %s1467_s6 = inlined_call_operand.vmem [shape: f32[1,128], index: 6, kind: input, shape index: {}]   ;;  %s1468_s4 = inlined_call_operand.vmem [shape: f32[1,128], index: 4, kind: input, shape index: {}]   ;;  %s1469_s1 = inlined_call_operand.vmem [shape: f32[16,4], index: 1, kind: input, shape index: {}]   ;;  %s1470_s10 = inlined_call_operand.vmem [shape: f32[1,128], index: 10, kind: input, shape index: {}]   ;;  %s1471_s11 = inlined_call_operand.vmem [shape: f32[16,128], index: 11, kind: output, shape index: {0}]   ;;  %s1472_s12 = inlined_call_operand.vmem [shape: f32[1,2,128], index: 12, kind: output, shape index: {1}]  }
   0x1   :  { %v42_v0 = vld [vmem:[%s1460_s2] sm:$0xf]  ;;  %v41_v2 = vld [vmem:[%s1461_s0 + $0x8] sm:$0xff]  ;;  %v613_v8 = vld [vmem:[%s1462_s7 + $0x10] sm:$0xff] }
   0x2   :  { %v40_v1 = vld [vmem:[%s1461_s0] sm:$0xff]  ;;  %991 = vmatprep.subr.msk.mxu0 %vm50_vm0, %v42_v0  ;;  %v612_v4 = vld [vmem:[%s1462_s7 + $0x8] sm:$0xff]  ;;  %v614_v9 = vld [vmem:[%s1462_s7 + $0x18] sm:$0xff] }
   0x3   :  { %993 = vmatprep.mubr.msk.f32.mxu0 %vm43_vm1, %v40_v1  ;;  %992 = vmatpush3.msk.msra.mxu0 %vm50_vm0, %v42_v0  ;;  %v611_v3 = vld [vmem:[%s1462_s7] sm:$0xff]  ;;  %v628_v7 = vld [vmem:[%s1463_s8 + $0x8] sm:$0xff]  ;;  %v1107_v11 = vpack.c.bf16 %v614_v9, %v613_v8  ;;  %v629_v12 = vld [vmem:[%s1463_s8 + $0x10] sm:$0xff] }
   0x4   :  { %994 = vmatmul.mubr.msk.f32.vlgmr.msra.gmra.mrb[0].mxu0 %vm43_vm1, %v41_v2  ;;  %v627_v5 = vld [vmem:[%s1463_s8] sm:$0xff]  ;;  %v1103_v6 = vpack.c.bf16 %v612_v4, %v611_v3  ;;  %v630_v13 = vld [vmem:[%s1463_s8 + $0x18] sm:$0xff]  ;;  %v616_v16 = vld [vmem:[%s1462_s7 + $0x28] sm:$0xff] }
   0x5   :  { %v1071_v10 = vpack.c.bf16 %v628_v7, %v627_v5  ;;  %v615_v14 = vld [vmem:[%s1462_s7 + $0x20] sm:$0xff]  ;;  %v1075_v15 = vpack.c.bf16 %v630_v13, %v629_v12  ;;  %v632_v18 = vld [vmem:[%s1463_s8 + $0x28] sm:$0xff]  ;;  %v617_v21 = vld [vmem:[%s1462_s7 + $0x30] sm:$0xff]  ;;  %v1177_v12 = vmov 683565275  }
   0x6   :  { %1104 = vmatprep.subr.bf16.mxu1 %v1103_v6  ;;  %v631_v17 = vld [vmem:[%s1463_s8 + $0x20] sm:$0xff]  ;;  %v1111_v19 = vpack.c.bf16 %v616_v16, %v615_v14  ;;  %v618_v22 = vld [vmem:[%s1462_s7 + $0x38] sm:$0xff]  ;;  %v633_v23 = vld [vmem:[%s1463_s8 + $0x30] sm:$0xff]  ;;  %v1178_v16 = vmov 2475754826  }
   0x7   :  { %1072 = vmatprep.subr.bf16.mxu0 %v1071_v10  ;;  %1106 = vmatpush3.bf16.msra.mxu1 %v1103_v6  ;;  %v1079_v20 = vpack.c.bf16 %v632_v18, %v631_v17  ;;  %v634_v24 = vld [vmem:[%s1463_s8 + $0x38] sm:$0xff]  ;;  %v1115_v25 = vpack.c.bf16 %v618_v22, %v617_v21  ;;  %v619_v27 = vld [vmem:[%s1462_s7 + $0x40] sm:$0xff]  ;;  %v620_v28 = vld [vmem:[%s1462_s7 + $0x48] sm:$0xff]  ;;  %v1179_v18 = vmov 2131351028  }
   0x8   :  { %1074 = vmatpush3.bf16.msra.mxu0 %v1071_v10  ;;  %1108 = vmatprep.subr.bf16.mxu1 %v1107_v11  ;;  %v1083_v26 = vpack.c.bf16 %v634_v24, %v633_v23  ;;  %v635_v29 = vld [vmem:[%s1463_s8 + $0x40] sm:$0xff]  ;;  %v636_v30 = vld [vmem:[%s1463_s8 + $0x48] sm:$0xff]  ;;  %v1119_v31 = vpack.c.bf16 %v620_v28, %v619_v27  ;;  %v621_v33 = vld [vmem:[%s1462_s7 + $0x50] sm:$0xff]  ;;  %v1181_v22 = vmov 920167782  }
   0x9   :  { %1076 = vmatprep.subr.bf16.mxu0 %v1075_v15  ;;  %v1087_v32 = vpack.c.bf16 %v636_v30, %v635_v29  ;;  %v622_v34 = vld [vmem:[%s1462_s7 + $0x58] sm:$0xff]  ;;  %v637_v35 = vld [vmem:[%s1463_s8 + $0x50] sm:$0xff]  ;;  %v623_v39 = vld [vmem:[%s1462_s7 + $0x60] sm:$0xff]  ;;  %v1182_v29 = vmov 1326507024  }
   0xa   :  { %v638_v36 = vld [vmem:[%s1463_s8 + $0x58] sm:$0xff]  ;;  %v1123_v37 = vpack.c.bf16 %v622_v34, %v621_v33  ;;  %v624_v40 = vld [vmem:[%s1462_s7 + $0x68] sm:$0xff]  ;;  %v639_v41 = vld [vmem:[%s1463_s8 + $0x60] sm:$0xff] }
   0xb   :  { %1110 = vmatpush3.bf16.msra.mxu1 %v1107_v11  ;;  %v1091_v38 = vpack.c.bf16 %v638_v36, %v637_v35  ;;  %v640_v42 = vld [vmem:[%s1463_s8 + $0x68] sm:$0xff]  ;;  %v1127_v43 = vpack.c.bf16 %v624_v40, %v623_v39  ;;  %v625_v45 = vld [vmem:[%s1462_s7 + $0x70] sm:$0xff]  ;;  %v626_v46 = vld [vmem:[%s1462_s7 + $0x78] sm:$0xff] }
   0xc   :  { %1078 = vmatpush3.bf16.msra.mxu0 %v1075_v15  ;;  %1112 = vmatprep.subr.bf16.mxu1 %v1111_v19  ;;  %v1095_v44 = vpack.c.bf16 %v640_v42, %v639_v41  ;;  %v641_v47 = vld [vmem:[%s1463_s8 + $0x70] sm:$0xff]  ;;  %v642_v48 = vld [vmem:[%s1463_s8 + $0x78] sm:$0xff]  ;;  %v1131_v49 = vpack.c.bf16 %v626_v46, %v625_v45  ;;  %v1360_v52 = vld [vmem:[%s1464_s9] sm:$0xf] }
   0xd   :  { %1080 = vmatprep.subr.bf16.mxu0 %v1079_v20  ;;  %v1099_v50 = vpack.c.bf16 %v642_v48, %v641_v47 }
   0xf   :  { %1114 = vmatpush3.bf16.msra.mxu1 %v1111_v19 }
  0x10   :  { %1082 = vmatpush3.bf16.msra.mxu0 %v1079_v20  ;;  %1116 = vmatprep.subr.bf16.mxu1 %v1115_v25  ;;  %v1180_v20 = vmov 2102212464  }
  0x11   :  { %1084 = vmatprep.subr.bf16.mxu0 %v1083_v26 }
  0x13   :  { %1118 = vmatpush3.bf16.msra.mxu1 %v1115_v25 }
  0x14   :  { %1086 = vmatpush3.bf16.msra.mxu0 %v1083_v26  ;;  %1120 = vmatprep.subr.bf16.mxu1 %v1119_v31 }
  0x15   :  { %1088 = vmatprep.subr.bf16.mxu0 %v1087_v32 }
  0x17   :  { %1122 = vmatpush3.bf16.msra.mxu1 %v1119_v31 }
  0x18   :  { %1090 = vmatpush3.bf16.msra.mxu0 %v1087_v32  ;;  %1124 = vmatprep.subr.bf16.mxu1 %v1123_v37 }
  0x19   :  { %1092 = vmatprep.subr.bf16.mxu0 %v1091_v38 }
  0x1b   :  { %1126 = vmatpush3.bf16.msra.mxu1 %v1123_v37 }
  0x1c   :  { %1094 = vmatpush3.bf16.msra.mxu0 %v1091_v38  ;;  %1128 = vmatprep.subr.bf16.mxu1 %v1127_v43 }
  0x1d   :  { %1096 = vmatprep.subr.bf16.mxu0 %v1095_v44 }
  0x1f   :  { %1130 = vmatpush3.bf16.msra.mxu1 %v1127_v43 }
  0x20   :  { %1098 = vmatpush3.bf16.msra.mxu0 %v1095_v44  ;;  %1132 = vmatprep.subr.bf16.mxu1 %v1131_v49 }
  0x21   :  { %1100 = vmatprep.subr.bf16.mxu0 %v1099_v50 }
  0x23   :  { %1134 = vmatpush3.bf16.msra.mxu1 %v1131_v49 }
  0x24   :  { %1102 = vmatpush3.bf16.msra.mxu0 %v1099_v50  ;;  %1066 = vmatprep.subr.msk.mxu1 %vm50_vm0, %v1360_v52 }
  0xd7   :  { %v995_v51 = vpop.f32.mrb[0].mxu0 }
  0xd8   :  { %v1362_v53 = vmul.f32 6.2831855, %v995_v51  ;;  %v120_v54 = vpop.f32.mrb[1].mxu0 }
  0xd9   :  { %v1366_v55 = vmul.f32 6.2831855, %v120_v54 }
  0xda   :  { %v235_v56 = vand.u32 2147483647, %v1362_v53  ;;  %v238_v57 = vand.u32 2139095040, %v1362_v53 }
  0xdb   :  { %v134_v58 = vand.u32 2139095040, %v1366_v55  ;;  %v131_v61 = vand.u32 2147483647, %v1366_v55 }
  0xdc   :  { %v239_v59 = vshrl.u32 %v238_v57, 23  ;;  %v242_v60 = vand.u32 8388607, %v235_v56 }
  0xdd   :  { %v135_v62 = vshrl.u32 %v134_v58, 23  ;;  %v1376_v3 = vand.u32 8388607, %v131_v61 }
  0xde   :  { %v925_v63 = vadd.s32 4294967169, %v239_v59  ;;  %v243_v2 = vor.u32 8388608, %v242_v60 }
  0xdf   :  { %v921_v0 = vadd.s32 4294967169, %v135_v62  ;;  %v139_v10 = vor.u32 8388608, %v1376_v3 }
  0xe0   :  { %v245_v1 = vadd.s32 1, %v925_v63  ;;  %v1378_v9 = vshll.u32 %v243_v2, 8 }
  0xe1   :  { %v141_v4 = vadd.s32 1, %v921_v0 }
  0xe2   :  { %vm246_vm2 = vcmp.gt.s32.totalorder %v245_v1, 0 }
  0xe3   :  { %v247_v5 = vsel %vm246_vm2, %v245_v1, 0  ;;  %vm142_vm3 = vcmp.gt.s32.totalorder %v141_v4, 0  ;;  %vm237_vm2 = vcmp.lt.s32.totalorder %v1362_v53, 0 }
  0xe4   :  { %v248_v6 = vshrl.u32 %v247_v5, 5  ;;  %v249_v7 = vand.u32 31, %v247_v5  ;;  %v143_v8 = vsel %vm142_vm3, %v141_v4, 0  ;;  %v179_v5 = vshll.u32 %v139_v10, 8 }
  0xe5   :  { %v1381_v14 = vshrl.u32 %v143_v8, 5  ;;  %v145_v15 = vand.u32 31, %v143_v8  ;;  %vm236_vm3 = vcmp.le.f32.partialorder %v235_v56, 0.7853982 }
  0xe6   :  { %v250_v11 = vsub.s32 32, %v249_v7  ;;  %v252_v13 = vshll.u32 %v1177_v12, %v249_v7  ;;  %v255_v17 = vshll.u32 %v1178_v16, %v249_v7  ;;  %v258_v19 = vshll.u32 %v1179_v18, %v249_v7 }
  0xe7   :  { %v261_v21 = vshll.u32 %v1180_v20, %v249_v7  ;;  %v264_v23 = vshll.u32 %v1181_v22, %v249_v7  ;;  %vm267_vm4 = vcmp.lt.s32.totalorder %v248_v6, 1  ;;  %vm268_vm5 = vcmp.lt.s32.totalorder %v248_v6, 2 }
  0xe8   :  { %v253_v24 = vshrl.u32 %v1178_v16, %v250_v11  ;;  %v256_v25 = vshrl.u32 %v1179_v18, %v250_v11  ;;  %v259_v26 = vshrl.u32 %v1180_v20, %v250_v11  ;;  %v251_v27 = vshrl.u32 %v1177_v12, %v250_v11 }
  0xe9   :  { %v262_v28 = vshrl.u32 %v1181_v22, %v250_v11  ;;  %v265_v30 = vshrl.u32 %v1182_v29, %v250_v11  ;;  %v146_v34 = vsub.s32 32, %v145_v15  ;;  %vm269_vm6 = vcmp.lt.s32.totalorder %v248_v6, 3 }
  0xea   :  { %v254_v31 = vor.u32 %v253_v24, %v252_v13  ;;  %v257_v32 = vor.u32 %v256_v25, %v255_v17  ;;  %v260_v33 = vor.u32 %v259_v26, %v258_v19  ;;  %vm270_vm7 = vcmp.lt.s32.totalorder %v248_v6, 4 }
  0xeb   :  { %v263_v35 = vor.u32 %v262_v28, %v261_v21  ;;  %v266_v36 = vor.u32 %v265_v30, %v264_v23  ;;  %v148_v44 = vshll.u32 %v1177_v12, %v145_v15  ;;  %v149_v47 = vshrl.u32 %v1178_v16, %v146_v34 }
  0xec   :  { %v271_v37 = vsel %vm267_vm4, %v251_v27, %v254_v31  ;;  %v272_v38 = vsel %vm270_vm7, %v260_v33, 2102212464  ;;  %v275_v39 = vsel %vm267_vm4, %v254_v31, %v257_v32  ;;  %v279_v40 = vsel %vm267_vm4, %v257_v32, %v260_v33 }
  0xed   :  { %v273_v41 = vsel %vm269_vm6, %v257_v32, %v272_v38  ;;  %v276_v42 = vsel %vm270_vm7, %v263_v35, 920167782  ;;  %v280_v43 = vsel %vm270_vm7, %v266_v36, 1326507024  ;;  %v151_v48 = vshll.u32 %v1178_v16, %v145_v15 }
  0xee   :  { %v277_v45 = vsel %vm269_vm6, %v260_v33, %v276_v42  ;;  %v281_v46 = vsel %vm269_vm6, %v263_v35, %v280_v43  ;;  %v274_v49 = vsel %vm268_vm5, %v271_v37, %v273_v41  ;;  %v152_v54 = vshrl.u32 %v1179_v18, %v146_v34 }
  0xef   :  { %v278_v50 = vsel %vm268_vm5, %v275_v39, %v277_v45  ;;  %v282_v51 = vsel %vm268_vm5, %v279_v40, %v281_v46  ;;  %v150_v62 = vor.u32 %v149_v47, %v148_v44  ;;  %v154_v0 = vshll.u32 %v1179_v18, %v145_v15 }
  0xf0   :  { %v1390_v57 = vmul.u32.u64.low %v1378_v9, %v282_v51  ;;  %v1391_v58 = vmul.u32.u64.high %v1378_v9, %v282_v51, %v1390_v57  ;;  %v1394_v59 = vmul.u32.u64.low %v1378_v9, %v278_v50  ;;  %v1395_v60 = vmul.u32.u64.high %v1378_v9, %v278_v50, %v1394_v59 }
  0xf1   :  { %v153_v63 = vor.u32 %v152_v54, %v151_v48  ;;  %v155_v1 = vshrl.u32 %v1180_v20, %v146_v34  ;;  %v157_v2 = vshll.u32 %v1180_v20, %v145_v15  ;;  %v158_v3 = vshrl.u32 %v1181_v22, %v146_v34 }
  0xf2   :  { %v161_v4 = vshrl.u32 %v1182_v29, %v146_v34  ;;  %v290_v6 = vmul.u32 %v1378_v9, %v274_v49  ;;  %v147_v7 = vshrl.u32 %v1177_v12, %v146_v34  ;;  %v160_v11 = vshll.u32 %v1181_v22, %v145_v15 }
  0xf3   :  { %v156_v8 = vor.u32 %v155_v1, %v154_v0  ;;  %vm292_vm8 = vc.u32 %v1391_v58, %v1394_v59  ;;  %v293_v13 = vadd.s32 1, %v1395_v60  ;;  %v159_v16 = vor.u32 %v158_v3, %v157_v2 }
  0xf4   :  { %vm163_vm9 = vcmp.lt.s32.totalorder %v1381_v14, 1  ;;  %v162_v17 = vor.u32 %v161_v4, %v160_v11  ;;  %vm165_vm10 = vcmp.lt.s32.totalorder %v1381_v14, 3  ;;  %vm166_vm11 = vcmp.lt.s32.totalorder %v1381_v14, 4 }
  0xf5   :  { %v171_v18 = vsel %vm163_vm9, %v150_v62, %v153_v63  ;;  %v294_v10 = vsel %vm292_vm8, %v293_v13, %v1395_v60  ;;  %v168_v19 = vsel %vm166_vm11, %v156_v8, 2102212464  ;;  %v172_v9 = vsel %vm166_vm11, %v159_v16, 920167782 }
  0xf6   :  { %v175_v12 = vsel %vm163_vm9, %v153_v63, %v156_v8  ;;  %v295_v20 = vadd.s32 %v294_v10, %v290_v6  ;;  %vm164_vm12 = vcmp.lt.s32.totalorder %v1381_v14, 2  ;;  %v173_v15 = vsel %vm165_vm10, %v156_v8, %v172_v9 }
  0xf7   :  { %v176_v21 = vsel %vm166_vm11, %v162_v17, 1326507024  ;;  %v167_v22 = vsel %vm163_vm9, %v147_v7, %v150_v62  ;;  %v169_v23 = vsel %vm165_vm10, %v153_v63, %v168_v19  ;;  %v174_v24 = vsel %vm164_vm12, %v171_v18, %v173_v15 }
  0xf8   :  { %v177_v25 = vsel %vm165_vm10, %v159_v16, %v176_v21  ;;  %v296_v26 = vadd.s32 536870912, %v295_v20  ;;  %v1405_v28 = vmul.u32.u64.low %v179_v5, %v174_v24  ;;  %v1406_v29 = vmul.u32.u64.high %v179_v5, %v174_v24, %v1405_v28 }
  0xf9   :  { %v178_v27 = vsel %vm164_vm12, %v175_v12, %v177_v25  ;;  %v170_v33 = vsel %vm164_vm12, %v167_v22, %v169_v23  ;;  %v291_v49 = vadd.s32 %v1394_v59, %v1391_v58  ;;  %vm133_vm4 = vcmp.lt.s32.totalorder %v1366_v55, 0 }
  0xfa   :  { %v1408_v30 = vmul.u32.u64.low %v179_v5, %v178_v27  ;;  %v1409_v31 = vmul.u32.u64.high %v179_v5, %v178_v27, %v1408_v30  ;;  %v297_v32 = vshrl.u32 %v296_v26, 30  ;;  %v189_v35 = vadd.s32 1, %v1406_v29 }
  0xfb   :  { %v186_v14 = vmul.u32 %v179_v5, %v170_v33  ;;  %vm132_vm5 = vcmp.le.f32.partialorder %v131_v61, 0.7853982  ;;  %vm327_vm12 = vweird.f32 %v1362_v53 }
  0xfc   :  { %v298_v34 = vshll.u32 %v297_v32, 30  ;;  %vm188_vm13 = vc.u32 %v1409_v31, %v1405_v28  ;;  %v187_v7 = vadd.s32 %v1405_v28, %v1409_v31  ;;  %v321_v59 = vsub.s32 4, %v297_v32 }
  0xfd   :  { %v190_v37 = vsel %vm188_vm13, %v189_v35, %v1406_v29 }
  0xfe   :  { %v299_v36 = vsub.s32 %v295_v20, %v298_v34  ;;  %v191_v38 = vadd.s32 %v190_v37, %v186_v14  ;;  %v322_v12 = vsel %vm237_vm2, %v321_v59, %v297_v32 }
  0xff   :  { %v324_v21 = vsel %vm236_vm3, 0, %v322_v12 }
 0x100   :  { %v301_v39 = vsub.s32 0, %v299_v36  ;;  %v192_v40 = vadd.s32 536870912, %v191_v38  ;;  %v328_v26 = vadd.s32 3, %v324_v21  ;;  %v567_v29 = vand.u32 3, %v324_v21 }
 0x102   :  { %v926_v41 = vmin.u32 %v301_v39, %v299_v36  ;;  %v193_v42 = vshrl.u32 %v192_v40, 30  ;;  %v329_v31 = vand.u32 3, %v328_v26  ;;  %vm569_vm6 = vcmp.eq.s32.totalorder %v567_v29, 0  ;;  %v941_v39 = vld [vmem:[%s1465_s5] ss:$0 sm:$0xff] }
 0x103   :  { %vm572_vm7 = vcmp.eq.s32.totalorder %v567_v29, 2  ;;  %vm568_vm10 = vcmp.lt.s32.totalorder %v567_v29, 2  ;;  %v609_v29 = vld [vmem:[%s1469_s1] sm:$0xff] }
 0x104   :  { %v303_v43 = vclz %v926_v41  ;;  %v194_v44 = vshll.u32 %v193_v42, 30  ;;  %v217_v25 = vsub.s32 4, %v193_v42  ;;  %vm334_vm8 = vcmp.eq.s32.totalorder %v329_v31, 2  ;;  %v929_v41 = vld [vmem:[%s1466_s3] ss:$0 sm:$0xff] }
 0x105   :  { %vm331_vm9 = vcmp.eq.s32.totalorder %v329_v31, 0  ;;  %vm330_vm11 = vcmp.lt.s32.totalorder %v329_v31, 2 }
 0x106   :  { %v927_v45 = vadd.s32 4294967294, %v303_v43  ;;  %v195_v46 = vsub.s32 %v191_v38, %v194_v44  ;;  %v218_v28 = vsel %vm133_vm4, %v217_v25, %v193_v42  ;;  %v942_v43 = vld [vmem:[%s1467_s6] ss:$0 sm:$0xff] }
 0x107   :  { %v220_v33 = vsel %vm132_vm5, 0, %v218_v28 }
 0x108   :  { %vm928_vm14 = vcmp.lt.s32.totalorder %v927_v45, 0  ;;  %v197_v48 = vsub.s32 0, %v195_v46  ;;  %v224_v37 = vadd.s32 3, %v220_v33 }
 0x109   :  { %v306_v47 = vsel %vm928_vm14, 0, %v927_v45  ;;  %v464_v45 = vand.u32 3, %v220_v33 }
 0x10a   :  { %v307_v50 = vsub.s32 32, %v306_v47  ;;  %v311_v51 = vsub.s32 4294967266, %v306_v47  ;;  %v922_v54 = vmin.u32 %v197_v48, %v195_v46  ;;  %v308_v57 = vshll.u32 %v299_v36, %v306_v47  ;;  %v930_v48 = vld [vmem:[%s1468_s4] ss:$0 sm:$0xff] }
 0x10b   :  { %vm465_vm13 = vcmp.lt.s32.totalorder %v464_v45, 2  ;;  %vm466_vm14 = vcmp.eq.s32.totalorder %v464_v45, 0 }
 0x10c   :  { %v309_v60 = vshrl.u32 %v291_v49, %v307_v50  ;;  %v312_v62 = vadd.s32 127, %v311_v51  ;;  %v199_v63 = vclz %v922_v54  ;;  %v225_v50 = vand.u32 3, %v224_v37 }
 0x10e   :  { %v310_v0 = vor.u32 %v309_v60, %v308_v57  ;;  %v313_v1 = vshll.u32 %v312_v62, 23  ;;  %v923_v2 = vadd.s32 4294967294, %v199_v63 }
 0x110   :  { %v314_v3 = vor.u32 4788187, %v313_v1  ;;  %vm924_vm15 = vcmp.lt.s32.totalorder %v923_v2, 0  ;;  %v317_v5 = vcvt.s32.f32 %v310_v0 }
 0x111   :  { %v202_v6 = vsel %vm924_vm15, 0, %v923_v2  ;;  %vm469_vm15 = vcmp.eq.s32.totalorder %v464_v45, 2 }
 0x112   :  { %v315_v4 = vand.u32 2147483647, %v314_v3  ;;  %v203_v8 = vsub.s32 32, %v202_v6  ;;  %v207_v11 = vsub.s32 4294967266, %v202_v6  ;;  %v204_v13 = vshll.u32 %v195_v46, %v202_v6 }
 0x114   :  { %v318_v58 = vmul.f32 %v317_v5, %v315_v4  ;;  %v205_v16 = vshrl.u32 %v187_v7, %v203_v8  ;;  %v208_v17 = vadd.s32 127, %v207_v11 }
 0x116   :  { %v319_v18 = vxor.u32 2147483648, %v318_v58  ;;  %v206_v10 = vor.u32 %v205_v16, %v204_v13  ;;  %v209_v19 = vshll.u32 %v208_v17, 23 }
 0x118   :  { %v320_v9 = vsel %vm237_vm2, %v319_v18, %v318_v58  ;;  %v210_v15 = vor.u32 4788187, %v209_v19  ;;  %v213_v23 = vcvt.s32.f32 %v206_v10  ;;  %vm230_vm2 = vcmp.eq.s32.totalorder %v225_v50, 2 }
 0x119   :  { %v323_v20 = vsel %vm236_vm3, %v1362_v53, %v320_v9  ;;  %vm227_vm3 = vcmp.eq.s32.totalorder %v225_v50, 0 }
 0x11a   :  { %1153 = vcosq.f32 %v323_v20  ;;  %v211_v22 = vand.u32 2147483647, %v210_v15 }
 0x11b   :  { %1155 = vsinq.f32 %v323_v20 }
 0x11c   :  { %v214_v24 = vmul.f32 %v213_v23, %v211_v22 }
 0x11e   :  { %v215_v27 = vxor.u32 2147483648, %v214_v24 }
 0x120   :  { %v216_v56 = vsel %vm133_vm4, %v215_v27, %v214_v24  ;;  %vm226_vm4 = vcmp.lt.s32.totalorder %v225_v50, 2 }
 0x121   :  { %v219_v30 = vsel %vm132_vm5, %v1366_v55, %v216_v56  ;;  %vm223_vm5 = vweird.f32 %v1366_v55 }
 0x122   :  { %1157 = vcosq.f32 %v219_v30 }
 0x123   :  { %1159 = vsinq.f32 %v219_v30  ;;  %v610_v30 = vld [vmem:[%s1469_s1 + $0x8] sm:$0xff] }
 0x124   :  { %v1154_v32 = vpop.eup %1153 }
 0x125   :  { %v1156_v34 = vpop.eup %1155  ;;  %v335_v35 = vxor.u32 2147483648, %v1154_v32 }
 0x126   :  { %v332_v14 = vxor.u32 2147483648, %v1156_v34 }
 0x127   :  { %v574_v36 = vsel %vm572_vm7, %v335_v35, %v1156_v34  ;;  %v336_v61 = vsel %vm334_vm8, %v335_v35, %v1156_v34  ;;  %v948_v34 = vld [vmem:[%s1470_s10] ss:$0 sm:$0xff] }
 0x128   :  { %v571_v38 = vsel %vm569_vm6, %v1154_v32, %v332_v14  ;;  %v333_v40 = vsel %vm331_vm9, %v1154_v32, %v332_v14 }
 0x129   :  { %v575_v42 = vsel %vm568_vm10, %v571_v38, %v574_v36  ;;  %v337_v44 = vsel %vm330_vm11, %v333_v40, %v336_v61 }
 0x12a   :  { %v576_v46 = vsel %vm327_vm12, nan, %v575_v42  ;;  %v338_v47 = vsel %vm327_vm12, nan, %v337_v44 }
 0x12b   :  { %v585_v49 = vmul.f32 %v941_v39, %v576_v46  ;;  %v347_v51 = vmul.f32 %v929_v41, %v338_v47 }
 0x12c   :  { %v1158_v54 = vpop.eup %1157 }
 0x12d   :  { %v594_v57 = vadd.f32 %v942_v43, %v585_v49  ;;  %v356_v60 = vadd.f32 %v930_v48, %v347_v51  ;;  %v1160_v53 = vpop.eup %1159  ;;  %v231_v62 = vxor.u32 2147483648, %v1158_v54 }
 0x12e   :  { %v228_v63 = vxor.u32 2147483648, %v1160_v53 }
 0x12f   :  { %v471_v0 = vsel %vm469_vm15, %v231_v62, %v1160_v53  ;;  %v944_v1 = vmul.f32 -1.442695, %v594_v57  ;;  %v232_v2 = vsel %vm230_vm2, %v231_v62, %v1160_v53  ;;  %v932_v5 = vmul.f32 -1.442695, %v356_v60 }
 0x130   :  { %v468_v3 = vsel %vm466_vm14, %v1158_v54, %v228_v63  ;;  %v229_v4 = vsel %vm227_vm3, %v1158_v54, %v228_v63 }
 0x131   :  { %v472_v6 = vsel %vm465_vm13, %v468_v3, %v471_v0  ;;  %v233_v7 = vsel %vm226_vm4, %v229_v4, %v232_v2  ;;  %1161 = vpow2.f32 %v944_v1 }
 0x132   :  { %v473_v8 = vsel %vm223_vm5, nan, %v472_v6  ;;  %v234_v11 = vsel %vm223_vm5, nan, %v233_v7  ;;  %1163 = vpow2.f32 %v932_v5 }
 0x133   :  { %v584_v58 = vmul.f32 %v941_v39, %v473_v8  ;;  %v346_v59 = vmul.f32 %v929_v41, %v234_v11 }
 0x135   :  { %v593_v13 = vadd.f32 %v942_v43, %v584_v58  ;;  %v355_v16 = vadd.f32 %v930_v48, %v346_v59 }
 0x137   :  { %v943_v17 = vmul.f32 -1.442695, %v593_v13  ;;  %v931_v18 = vmul.f32 -1.442695, %v355_v16 }
 0x139   :  { %1165 = vpow2.f32 %v943_v17 }
 0x13a   :  { %1167 = vpow2.f32 %v931_v18 }
 0x13b   :  { %v1162_v10 = vpop.eup %1161 }
 0x13c   :  { %v1164_v19 = vpop.eup %1163  ;;  %v602_v9 = vadd.f32 1.0, %v1162_v10 }
 0x13d   :  { %v364_v12 = vadd.f32 1.0, %v1164_v19 }
 0x13e   :  { %1169 = vrcp.f32 %v602_v9 }
 0x13f   :  { %1171 = vrcp.f32 %v364_v12 }
 0x143   :  { %v1166_v20 = vpop.eup %1165 }
 0x144   :  { %v1168_v55 = vpop.eup %1167  ;;  %v601_v15 = vadd.f32 1.0, %v1166_v20 }
 0x145   :  { %v363_v21 = vadd.f32 1.0, %v1168_v55 }
 0x146   :  { %1173 = vrcp.f32 %v601_v15 }
 0x147   :  { %1175 = vrcp.f32 %v363_v21 }
 0x148   :  { %v1170_v22 = vpop.eup %1169 }
 0x149   :  { %v1172_v23 = vpop.eup %1171  ;;  %v608_v56 = vmul.f32 %v1170_v22, %v594_v57 }
 0x14a   :  { %v370_v28 = vmul.f32 %v1172_v23, %v356_v60 }
 0x150   :  { %v1174_v24 = vpop.eup %1173 }
 0x151   :  { %v1176_v25 = vpop.eup %1175  ;;  %v607_v26 = vmul.f32 %v1174_v24, %v593_v13 }
 0x152   :  { %v369_v27 = vmul.f32 %v1176_v25, %v355_v16 }
 0x153   :  { %1028 = vmatprep.mubr.f32.mxu0 %v607_v26 }
 0x154   :  { %1063 = vmatprep.mubr.f32.mxu1 %v369_v27  ;;  %1029 = vmatmul.mubr.f32.vlgmr.msra.gmra.mrb[2].mxu0 %v608_v56 }
 0x155   :  { %1064 = vmatmul.mubr.f32.vlgmr.msra.gmra.mrb[0].mxu1 %v370_v28 }
 0x156   :  { %1067 = vmatpush3.msk.msra.mxu1 %vm50_vm0, %v1360_v52  ;;  %1068 = vmatprep.mubr.msk.f32.mxu1 %vm43_vm1, %v609_v29  ;;  %vm907_vm0 = vcmask 1040384  }
 0x15d   :  { %1069 = vmatmul.mubr.msk.f32.vlgmr.msra.gmra.mrb[0].mxu1 %vm43_vm1, %v610_v30 }
 0x227   :  { %v1030_v31 = vpop.f32.mrb[2].mxu0 }
 0x228   :  { %v709_v32 = vpop.f32.mrb[3].mxu0 }
 0x230   :  { %v1070_v33 = vpop.f32.mrb[0].mxu1 }
 0x231   :  { %v1135_v35 = vadd.f32 %v1070_v33, %v1030_v31  ;;  %v869_v14 = vpop.f32.mrb[1].mxu1 }
 0x232   :  { %v1136_v36 = vadd.f32 %v869_v14, %v709_v32 }
 0x233   :  { %v888_v37 = vadd.f32 %v1135_v35, %v948_v34 }
 0x234   :  { %v887_v52 = vadd.f32 %v1136_v36, %v948_v34 }
 0x235   :  { %890 = vst [vmem:[%s1471_s11 + $0x8] sm:$0xff] %v888_v37  ;;  %v899_v61 = vmul.f32 %v888_v37, %v888_v37 }
 0x236   :  { %889 = vst [vmem:[%s1471_s11] sm:$0xff] %v887_v52  ;;  %v891_v38 = vadd.f32 %v888_v37, %v887_v52  ;;  %v898_v39 = vmul.f32 %v887_v52, %v887_v52 }
 0x238   :  { %v892_v40 = vrot.slane %v891_v38, 4  ;;  %v900_v41 = vadd.f32 %v899_v61, %v898_v39 }
 0x23a   :  { %v893_v42 = vadd.f32 %v892_v40, %v891_v38  ;;  %v901_v43 = vrot.slane %v900_v41, 4 }
 0x23c   :  { %v894_v44 = vrot.slane %v893_v42, 2  ;;  %v902_v45 = vadd.f32 %v901_v43, %v900_v41 }
 0x23e   :  { %v895_v46 = vadd.f32 %v894_v44, %v893_v42  ;;  %v903_v47 = vrot.slane %v902_v45, 2 }
 0x240   :  { %v896_v48 = vrot.slane %v895_v46, 1  ;;  %v904_v49 = vadd.f32 %v903_v47, %v902_v45 }
 0x242   :  { %v905_v50 = vrot.slane %v904_v49, 1  ;;  %v897_v51 = vadd.f32 %v896_v48, %v895_v46 }
 0x244   :  { %v906_v54 = vadd.f32 %v905_v50, %v904_v49 }
 0x246   :  { %v908_v57 = vsel %vm907_vm0, %v897_v51, %v906_v54 }
 0x247   :  { %909 = vst [vmem:[%s1472_s12] sm:$0x3] %v908_v57 }

</bundles_post_ra>
